<compile_context>
chip_gen: v5e
topology: v5e:2x2
jax: 0.10.0
libtpu: 0.0.40
codegen_flags: <defaults>
</compile_context>

<pallas_src>
import jax
import jax.numpy as jnp
from jax.experimental import pallas as pl
from jax.experimental.pallas import tpu as pltpu

D_IN = 28 * 28          # 784
D_PAD = 7 * 128         # 896: lane-dense padding of the 784-wide output dim
H1 = 256
H2 = 128
LAT = 2
CAT = 256               # padded width of the fused [w34 | w3] MXU pass

DEFAULT_TB = 512                       # batch rows per grid step
VMEM_LIMIT_BYTES = 48 * 1024 * 1024    # explicit scoped-VMEM cap (< v7x 64 MiB)


def _ae_kernel(x_ref,
               w1_ref, b1_ref, w2_ref, b2_ref,
               wcat_ref, bcat_ref,
               w5_ref, b5_ref, w6_ref, b6_ref,
               enc_ref, dec_ref):
    # bf16 operands into the MXU, f32 accumulation, f32 transcendentals.
    x = x_ref[...].astype(jnp.bfloat16)                                    # (TB, 784)

    # ---------------- encoder ----------------
    h = jnp.dot(x, w1_ref[...], preferred_element_type=jnp.float32) + b1_ref[...]
    h = jnp.tanh(h).astype(jnp.bfloat16)                                   # (TB, 256)
    h = jnp.dot(h, w2_ref[...], preferred_element_type=jnp.float32) + b2_ref[...]
    h2 = jnp.tanh(h).astype(jnp.bfloat16)                                  # (TB, 128)

    # ------- fused latent + first-decoder pass -------
    # wcat = [w3@w4 | w3 | 0-pad] (128, 256), bcat = [b3@w4+b4 | b3 | 0]:
    #   cols [0:128]   -> pre-tanh decoder activations (2-wide latent folded)
    #   cols [128:130] -> the latent code itself (side output `encoded`)
    y = jnp.dot(h2, wcat_ref[...], preferred_element_type=jnp.float32) + bcat_ref[...]
    enc_ref[...] = y[:, H2:H2 + LAT].astype(enc_ref.dtype)                # (TB, 2)
    d = jnp.tanh(y[:, :H2]).astype(jnp.bfloat16)                           # (TB, 128)

    # ---------------- decoder ----------------
    d = jnp.dot(d, w5_ref[...], preferred_element_type=jnp.float32) + b5_ref[...]
    d = jnp.tanh(d).astype(jnp.bfloat16)                                   # (TB, 256)
    d = jnp.dot(d, w6_ref[...], preferred_element_type=jnp.float32) + b6_ref[...]
    # sigmoid(z) == 0.5*tanh(0.5*z) + 0.5 : single EUP tanh instead of exp+recip.
    d = 0.5 * jnp.tanh(0.5 * d) + 0.5                                      # (TB, 896)
    dec_ref[...] = d.astype(dec_ref.dtype)                                 # lane-dense store


def _const_spec(shape):
    """Full-array block with a constant block index (weights stay resident
    across grid steps).  Single-buffered via pipeline_mode when supported."""
    imap = lambda i: (0,) * len(shape)
    try:
        return pl.BlockSpec(shape, imap, pipeline_mode=pl.Buffered(1))
    except (AttributeError, TypeError):   # older Pallas without pipeline_mode
        return pl.BlockSpec(shape, imap)


def _round_up(n, m):
    return (n + m - 1) // m * m


def _choose_tiling(B, block_batch):
    """Pick (tile_rows, n_tiles, padded_B).  Multi-tile tiles are multiples of
    16 rows (bf16 sublane packing / (8,128) rule); batches large enough for a
    single big tile are split in two so the 'parallel' grid axis can occupy
    both v7x TensorCores."""
    b_full = _round_up(max(B, 8), 8)
    if b_full <= block_batch and b_full < 512:
        return b_full, 1, b_full                      # one full-array tile
    n_tiles = max(2, pl.cdiv(b_full, _round_up(block_batch, 16)))
    tb = _round_up(pl.cdiv(b_full, n_tiles), 16)
    return tb, n_tiles, n_tiles * tb


def prepare_kernel_params(params):
    """Fold / pad / cast the fp32 params into the kernel layout.

    Input: flat list [w1,b1,...,w6,b6], weights (in_features, out_features),
    biases (1, out_features).  Returns bf16 weights + f32 biases:
      (w1, b1, w2, b2, wcat, bcat, w5, b5, w6p, b6p)
    """
    w1, b1, w2, b2, w3, b3, w4, b4, w5, b5, w6, b6 = params

    # Pre-fold the 2-wide bottleneck in f32 and fuse the latent side-output
    # into the same MXU pass; zero-pad columns to a lane-dense 256.
    w34 = w3 @ w4                                   # (128, 128)
    b34 = b3 @ w4 + b4                              # (1, 128)
    wcat = jnp.concatenate([w34, w3], axis=1)       # (128, 130)
    bcat = jnp.concatenate([b34, b3], axis=1)       # (1, 130)
    wcat = jnp.pad(wcat, ((0, 0), (0, CAT - wcat.shape[1])))
    bcat = jnp.pad(bcat, ((0, 0), (0, CAT - bcat.shape[1])))

    # Lane-dense padding of the 784-wide output layer (sliced off in wrapper).
    w6p = jnp.pad(w6, ((0, 0), (0, D_PAD - D_IN)))
    b6p = jnp.pad(b6, ((0, 0), (0, D_PAD - D_IN)))

    bf16 = lambda w: w.astype(jnp.bfloat16)
    return (bf16(w1), b1, bf16(w2), b2, bf16(wcat), bcat,
            bf16(w5), b5, bf16(w6p), b6p)


def autoencoder_forward(x, params, *, block_batch=DEFAULT_TB):
    """Forward pass matching the PyTorch module.

    x: (B, 784); bf16 preferred at the boundary (f32 also accepted, cast
    tile-by-tile inside the kernel).  params: flat fp32 list [w1,b1,...,w6,b6]
    with weights shaped (in_features, out_features), biases (1, out_features).

    Returns (encoded (B, 2) f32, decoded (B, 784) bf16).
    """
    B, d_in = x.shape
    assert d_in == D_IN, f"expected {D_IN} input features, got {d_in}"
    kparams = prepare_kernel_params(params)

    tb, n_tiles, B_pad = _choose_tiling(B, block_batch)
    xp = x if B_pad == B else jnp.pad(x, ((0, B_pad - B), (0, 0)))
    # TODO(synk): producers that can supply x already padded to 896 lanes would
    # also get unmasked x loads; not done here to avoid an extra wrapper-side
    # HBM pass over x.

    batch_spec = lambda cols: pl.BlockSpec((tb, cols), lambda i: (i, 0))

    enc, dec = pl.pallas_call(
        _ae_kernel,
        grid=(n_tiles,),
        in_specs=[batch_spec(D_IN)] + [_const_spec(p.shape) for p in kparams],
        out_specs=[batch_spec(LAT), batch_spec(D_PAD)],
        out_shape=(
            jax.ShapeDtypeStruct((B_pad, LAT), jnp.float32),
            jax.ShapeDtypeStruct((B_pad, D_PAD), jnp.bfloat16),
        ),
        compiler_params=pltpu.CompilerParams(
            # Batch tiles are independent -> shard across both v7x TensorCores.
            dimension_semantics=("parallel",),
            # Scoped-VMEM default (16/32 MiB) can bite at large tiles even
            # though physical VMEM is fine; set the cap explicitly.
            vmem_limit_bytes=VMEM_LIMIT_BYTES),
    )(xp, *kparams)

    return enc[:B], dec[:B, :D_IN]


def init_params(key):
    """PyTorch-style (uniform +/- 1/sqrt(fan_in)) init, fp32.

    Weights stored as (in_features, out_features); biases as (1, out_features).
    """
    dims = [(D_IN, H1), (H1, H2), (H2, LAT),    # encoder
            (LAT, H2), (H2, H1), (H1, D_IN)]    # decoder
    params = []
    for (fan_in, fan_out) in dims:
        key, kw, kb = jax.random.split(key, 3)
        bound = 1.0 / jnp.sqrt(float(fan_in))
        w = jax.random.uniform(kw, (fan_in, fan_out), jnp.float32, -bound, bound)
        b = jax.random.uniform(kb, (1, fan_out), jnp.float32, -bound, bound)
        params += [w, b]
    return params


def reference_forward(x, params):
    """Pure-JAX reference: original (unfolded) layer order, with x / weights
    rounded to bf16 like the kernel, math and biases in f32."""
    r = lambda a: a.astype(jnp.bfloat16).astype(jnp.float32)
    w1, b1, w2, b2, w3, b3, w4, b4, w5, b5, w6, b6 = params
    h = jnp.tanh(r(x) @ r(w1) + b1)
    h = jnp.tanh(r(h) @ r(w2) + b2)
    enc = r(h) @ r(w3) + b3
    d = jnp.tanh(enc @ r(w4) + b4)
    d = jnp.tanh(r(d) @ r(w5) + b5)
    dec = jax.nn.sigmoid(r(d) @ r(w6) + b6)
    return enc, dec


if __name__ == "__main__":
    key = jax.random.PRNGKey(0)
    kp, kx = jax.random.split(key)

    params = init_params(kp)

    B = 8
    x_f32 = jax.random.uniform(kx, (B, D_IN), jnp.float32)   # MNIST-like pixels
    # bf16 at the producer: this is the dtype the kernel consumes, so no extra
    # wrapper-side HBM cast pass is paid.
    x = x_f32.astype(jnp.bfloat16)

    enc, dec = autoencoder_forward(x, params)
    enc, dec = jax.block_until_ready((enc, dec))

    enc_ref, dec_ref = reference_forward(x_f32, params)
    assert enc.shape == (B, LAT) and dec.shape == (B, D_IN)
    assert dec.dtype == jnp.bfloat16
    # bf16 weights/IO + latent-fold reassociation -> loose tolerance vs the
    # bf16-matched reference.
    assert jnp.allclose(enc, enc_ref, atol=2e-2, rtol=2e-2)
    assert jnp.allclose(dec.astype(jnp.float32), dec_ref, atol=2e-2, rtol=2e-2)

    print("KERNEL_OK")
</pallas_src>

<mosaic_0001>
module attributes {stable_mosaic.version = 11 : i64} {
  func.func @_ae_kernel(%arg0: i32, %arg1: memref<8x784xbf16, #tpu.memory_space<vmem>>, %arg2: memref<784x256xbf16, #tpu.memory_space<vmem>>, %arg3: memref<1x256xf32, #tpu.memory_space<vmem>>, %arg4: memref<256x128xbf16, #tpu.memory_space<vmem>>, %arg5: memref<1x128xf32, #tpu.memory_space<vmem>>, %arg6: memref<128x256xbf16, #tpu.memory_space<vmem>>, %arg7: memref<1x256xf32, #tpu.memory_space<vmem>>, %arg8: memref<128x256xbf16, #tpu.memory_space<vmem>>, %arg9: memref<1x256xf32, #tpu.memory_space<vmem>>, %arg10: memref<256x896xbf16, #tpu.memory_space<vmem>>, %arg11: memref<1x896xf32, #tpu.memory_space<vmem>>, %arg12: memref<8x2xf32, #tpu.memory_space<vmem>>, %arg13: memref<8x896xbf16, #tpu.memory_space<vmem>>) attributes {dimension_semantics = [#tpu.dimension_semantics<parallel>], iteration_bounds = array<i64: 1>, scalar_prefetch = 0 : i64, scratch_operands = 0 : i64, tpu.core_type = #tpu.core_type<tc>, window_params = [{transform_indices = @transform_0, window_bounds = array<i64: 8, 784>}, {pipeline_mode = #tpu.pipeline_mode<synchronous>, transform_indices = @transform_1, window_bounds = array<i64: 784, 256>}, {pipeline_mode = #tpu.pipeline_mode<synchronous>, transform_indices = @transform_2, window_bounds = array<i64: 1, 256>}, {pipeline_mode = #tpu.pipeline_mode<synchronous>, transform_indices = @transform_3, window_bounds = array<i64: 256, 128>}, {pipeline_mode = #tpu.pipeline_mode<synchronous>, transform_indices = @transform_4, window_bounds = array<i64: 1, 128>}, {pipeline_mode = #tpu.pipeline_mode<synchronous>, transform_indices = @transform_5, window_bounds = array<i64: 128, 256>}, {pipeline_mode = #tpu.pipeline_mode<synchronous>, transform_indices = @transform_6, window_bounds = array<i64: 1, 256>}, {pipeline_mode = #tpu.pipeline_mode<synchronous>, transform_indices = @transform_7, window_bounds = array<i64: 128, 256>}, {pipeline_mode = #tpu.pipeline_mode<synchronous>, transform_indices = @transform_8, window_bounds = array<i64: 1, 256>}, {pipeline_mode = #tpu.pipeline_mode<synchronous>, transform_indices = @transform_9, window_bounds = array<i64: 256, 896>}, {pipeline_mode = #tpu.pipeline_mode<synchronous>, transform_indices = @transform_10, window_bounds = array<i64: 1, 896>}, {transform_indices = @transform_11, window_bounds = array<i64: 8, 2>}, {transform_indices = @transform_12, window_bounds = array<i64: 8, 896>}]} {
    %c0 = arith.constant 0 : index
    %c0_0 = arith.constant 0 : index
    %0 = vector.load %arg1[%c0, %c0_0] : memref<8x784xbf16, #tpu.memory_space<vmem>>, vector<8x784xbf16>
    %c0_1 = arith.constant 0 : index
    %c0_2 = arith.constant 0 : index
    %1 = vector.load %arg2[%c0_1, %c0_2] : memref<784x256xbf16, #tpu.memory_space<vmem>>, vector<784x256xbf16>
    %cst = arith.constant dense<0.000000e+00> : vector<8x256xf32>
    %2 = tpu.matmul %0, %1, %cst {dimension_numbers = #tpu.dot_dimension_numbers<[1], [0], [0], [1], [0, 0, 1, 1], [], []>} : vector<8x784xbf16>, vector<784x256xbf16>, vector<8x256xf32> -> vector<8x256xf32>
    %c0_3 = arith.constant 0 : index
    %c0_4 = arith.constant 0 : index
    %3 = vector.load %arg3[%c0_3, %c0_4] : memref<1x256xf32, #tpu.memory_space<vmem>>, vector<1x256xf32>
    %4 = vector.broadcast %3 : vector<1x256xf32> to vector<8x256xf32>
    %5 = arith.addf %2, %4 : vector<8x256xf32>
    %6 = math.tanh %5 : vector<8x256xf32>
    %7 = arith.truncf %6 : vector<8x256xf32> to vector<8x256xbf16>
    %c0_5 = arith.constant 0 : index
    %c0_6 = arith.constant 0 : index
    %8 = vector.load %arg4[%c0_5, %c0_6] : memref<256x128xbf16, #tpu.memory_space<vmem>>, vector<256x128xbf16>
    %cst_7 = arith.constant dense<0.000000e+00> : vector<8x128xf32>
    %9 = tpu.matmul %7, %8, %cst_7 {dimension_numbers = #tpu.dot_dimension_numbers<[1], [0], [0], [1], [0, 0, 1, 1], [], []>} : vector<8x256xbf16>, vector<256x128xbf16>, vector<8x128xf32> -> vector<8x128xf32>
    %c0_8 = arith.constant 0 : index
    %c0_9 = arith.constant 0 : index
    %10 = vector.load %arg5[%c0_8, %c0_9] : memref<1x128xf32, #tpu.memory_space<vmem>>, vector<1x128xf32>
    %11 = vector.broadcast %10 : vector<1x128xf32> to vector<8x128xf32>
    %12 = arith.addf %9, %11 : vector<8x128xf32>
    %13 = math.tanh %12 : vector<8x128xf32>
    %14 = arith.truncf %13 : vector<8x128xf32> to vector<8x128xbf16>
    %c0_10 = arith.constant 0 : index
    %c0_11 = arith.constant 0 : index
    %15 = vector.load %arg6[%c0_10, %c0_11] : memref<128x256xbf16, #tpu.memory_space<vmem>>, vector<128x256xbf16>
    %cst_12 = arith.constant dense<0.000000e+00> : vector<8x256xf32>
    %16 = tpu.matmul %14, %15, %cst_12 {dimension_numbers = #tpu.dot_dimension_numbers<[1], [0], [0], [1], [0, 0, 1, 1], [], []>} : vector<8x128xbf16>, vector<128x256xbf16>, vector<8x256xf32> -> vector<8x256xf32>
    %c0_13 = arith.constant 0 : index
    %c0_14 = arith.constant 0 : index
    %17 = vector.load %arg7[%c0_13, %c0_14] : memref<1x256xf32, #tpu.memory_space<vmem>>, vector<1x256xf32>
    %18 = vector.broadcast %17 : vector<1x256xf32> to vector<8x256xf32>
    %19 = arith.addf %16, %18 : vector<8x256xf32>
    %20 = vector.extract_strided_slice %19 {offsets = [0, 128], sizes = [8, 2], strides = [1, 1]} : vector<8x256xf32> to vector<8x2xf32>
    %c0_15 = arith.constant 0 : index
    %c0_16 = arith.constant 0 : index
    %21 = vector.load %arg12[%c0_15, %c0_16] : memref<8x2xf32, #tpu.memory_space<vmem>>, vector<8x2xf32>
    tpu.vector_store %arg12[%c0_15, %c0_16], %20 {strides = array<i32>} : memref<8x2xf32, #tpu.memory_space<vmem>>, vector<8x2xf32>,
    %22 = vector.extract_strided_slice %19 {offsets = [0, 0], sizes = [8, 128], strides = [1, 1]} : vector<8x256xf32> to vector<8x128xf32>
    %23 = math.tanh %22 : vector<8x128xf32>
    %24 = arith.truncf %23 : vector<8x128xf32> to vector<8x128xbf16>
    %c0_17 = arith.constant 0 : index
    %c0_18 = arith.constant 0 : index
    %25 = vector.load %arg8[%c0_17, %c0_18] : memref<128x256xbf16, #tpu.memory_space<vmem>>, vector<128x256xbf16>
    %cst_19 = arith.constant dense<0.000000e+00> : vector<8x256xf32>
    %26 = tpu.matmul %24, %25, %cst_19 {dimension_numbers = #tpu.dot_dimension_numbers<[1], [0], [0], [1], [0, 0, 1, 1], [], []>} : vector<8x128xbf16>, vector<128x256xbf16>, vector<8x256xf32> -> vector<8x256xf32>
    %c0_20 = arith.constant 0 : index
    %c0_21 = arith.constant 0 : index
    %27 = vector.load %arg9[%c0_20, %c0_21] : memref<1x256xf32, #tpu.memory_space<vmem>>, vector<1x256xf32>
    %28 = vector.broadcast %27 : vector<1x256xf32> to vector<8x256xf32>
    %29 = arith.addf %26, %28 : vector<8x256xf32>
    %30 = math.tanh %29 : vector<8x256xf32>
    %31 = arith.truncf %30 : vector<8x256xf32> to vector<8x256xbf16>
    %c0_22 = arith.constant 0 : index
    %c0_23 = arith.constant 0 : index
    %32 = vector.load %arg10[%c0_22, %c0_23] : memref<256x896xbf16, #tpu.memory_space<vmem>>, vector<256x896xbf16>
    %cst_24 = arith.constant dense<0.000000e+00> : vector<8x896xf32>
    %33 = tpu.matmul %31, %32, %cst_24 {dimension_numbers = #tpu.dot_dimension_numbers<[1], [0], [0], [1], [0, 0, 1, 1], [], []>} : vector<8x256xbf16>, vector<256x896xbf16>, vector<8x896xf32> -> vector<8x896xf32>
    %c0_25 = arith.constant 0 : index
    %c0_26 = arith.constant 0 : index
    %34 = vector.load %arg11[%c0_25, %c0_26] : memref<1x896xf32, #tpu.memory_space<vmem>>, vector<1x896xf32>
    %35 = vector.broadcast %34 : vector<1x896xf32> to vector<8x896xf32>
    %36 = arith.addf %33, %35 : vector<8x896xf32>
    %cst_27 = arith.constant 5.000000e-01 : f32
    %37 = vector.broadcast %cst_27 : f32 to vector<8x896xf32>
    %38 = arith.mulf %37, %36 : vector<8x896xf32>
    %39 = math.tanh %38 : vector<8x896xf32>
    %cst_28 = arith.constant 5.000000e-01 : f32
    %40 = vector.broadcast %cst_28 : f32 to vector<8x896xf32>
    %41 = arith.mulf %40, %39 : vector<8x896xf32>
    %cst_29 = arith.constant 5.000000e-01 : f32
    %42 = vector.broadcast %cst_29 : f32 to vector<8x896xf32>
    %43 = arith.addf %41, %42 : vector<8x896xf32>
    %44 = arith.truncf %43 : vector<8x896xf32> to vector<8x896xbf16>
    %c0_30 = arith.constant 0 : index
    %c0_31 = arith.constant 0 : index
    %45 = vector.load %arg13[%c0_30, %c0_31] : memref<8x896xbf16, #tpu.memory_space<vmem>>, vector<8x896xbf16>
    tpu.vector_store %arg13[%c0_30, %c0_31], %44 {strides = array<i32>} : memref<8x896xbf16, #tpu.memory_space<vmem>>, vector<8x896xbf16>,
    return
  }
  func.func @transform_0(%arg0: i32) -> (i32, i32) {
    %c0_i32 = arith.constant 0 : i32
    %c0_i32_0 = arith.constant 0 : i32
    return %arg0, %c0_i32 : i32, i32
  }
  func.func @transform_1(%arg0: i32) -> (i32, i32) {
    %c0_i32 = arith.constant 0 : i32
    %c0_i32_0 = arith.constant 0 : i32
    %c0_i32_1 = arith.constant 0 : i32
    return %c0_i32, %c0_i32_0 : i32, i32
  }
  func.func @transform_2(%arg0: i32) -> (i32, i32) {
    %c0_i32 = arith.constant 0 : i32
    %c0_i32_0 = arith.constant 0 : i32
    %c0_i32_1 = arith.constant 0 : i32
    return %c0_i32, %c0_i32_0 : i32, i32
  }
  func.func @transform_3(%arg0: i32) -> (i32, i32) {
    %c0_i32 = arith.constant 0 : i32
    %c0_i32_0 = arith.constant 0 : i32
    %c0_i32_1 = arith.constant 0 : i32
    return %c0_i32, %c0_i32_0 : i32, i32
  }
  func.func @transform_4(%arg0: i32) -> (i32, i32) {
    %c0_i32 = arith.constant 0 : i32
    %c0_i32_0 = arith.constant 0 : i32
    %c0_i32_1 = arith.constant 0 : i32
    return %c0_i32, %c0_i32_0 : i32, i32
  }
  func.func @transform_5(%arg0: i32) -> (i32, i32) {
    %c0_i32 = arith.constant 0 : i32
    %c0_i32_0 = arith.constant 0 : i32
    %c0_i32_1 = arith.constant 0 : i32
    return %c0_i32, %c0_i32_0 : i32, i32
  }
  func.func @transform_6(%arg0: i32) -> (i32, i32) {
    %c0_i32 = arith.constant 0 : i32
    %c0_i32_0 = arith.constant 0 : i32
    %c0_i32_1 = arith.constant 0 : i32
    return %c0_i32, %c0_i32_0 : i32, i32
  }
  func.func @transform_7(%arg0: i32) -> (i32, i32) {
    %c0_i32 = arith.constant 0 : i32
    %c0_i32_0 = arith.constant 0 : i32
    %c0_i32_1 = arith.constant 0 : i32
    return %c0_i32, %c0_i32_0 : i32, i32
  }
  func.func @transform_8(%arg0: i32) -> (i32, i32) {
    %c0_i32 = arith.constant 0 : i32
    %c0_i32_0 = arith.constant 0 : i32
    %c0_i32_1 = arith.constant 0 : i32
    return %c0_i32, %c0_i32_0 : i32, i32
  }
  func.func @transform_9(%arg0: i32) -> (i32, i32) {
    %c0_i32 = arith.constant 0 : i32
    %c0_i32_0 = arith.constant 0 : i32
    %c0_i32_1 = arith.constant 0 : i32
    return %c0_i32, %c0_i32_0 : i32, i32
  }
  func.func @transform_10(%arg0: i32) -> (i32, i32) {
    %c0_i32 = arith.constant 0 : i32
    %c0_i32_0 = arith.constant 0 : i32
    %c0_i32_1 = arith.constant 0 : i32
    return %c0_i32, %c0_i32_0 : i32, i32
  }
  func.func @transform_11(%arg0: i32) -> (i32, i32) {
    %c0_i32 = arith.constant 0 : i32
    %c0_i32_0 = arith.constant 0 : i32
    return %arg0, %c0_i32 : i32, i32
  }
  func.func @transform_12(%arg0: i32) -> (i32, i32) {
    %c0_i32 = arith.constant 0 : i32
    %c0_i32_0 = arith.constant 0 : i32
    return %arg0, %c0_i32 : i32, i32
  }
}

</mosaic_0001>

<bundles_post_ra>
// kernel: tpu_custom_call.1
= control target key start
LH: loop header
LB: loop body
LE: loop exit
PB: predicated region body
PF: predicated region fallthrough
CT: control target
= control target key end

     0   :  { %18 = vsyncpa [#allocation3], 0  ;;  %s4154_s0 = inlined_call_operand.hbm [shape: bf16[8,784], index: 0, kind: input, shape index: {}]   ;;  %s4155_s1 = inlined_call_operand.hbm [shape: bf16[784,256], index: 1, kind: input, shape index: {}]   ;;  %s4156_s2 = inlined_call_operand.hbm [shape: f32[1,256], index: 2, kind: input, shape index: {}]   ;;  %s4157_s3 = inlined_call_operand.hbm [shape: bf16[256,128], index: 3, kind: input, shape index: {}]   ;;  %s4158_s4 = inlined_call_operand.hbm [shape: f32[1,128], index: 4, kind: input, shape index: {}]   ;;  %s4159_s5 = inlined_call_operand.hbm [shape: bf16[128,256], index: 5, kind: input, shape index: {}]   ;;  %s4160_s6 = inlined_call_operand.vmem [shape: f32[1,256], index: 6, kind: input, shape index: {}]   ;;  %s4161_s7 = inlined_call_operand.hbm [shape: bf16[128,256], index: 7, kind: input, shape index: {}]   ;;  %s4162_s8 = inlined_call_operand.hbm [shape: f32[1,256], index: 8, kind: input, shape index: {}]   ;;  %s4163_s9 = inlined_call_operand.hbm [shape: bf16[256,896], index: 9, kind: input, shape index: {}]   ;;  %s4164_s10 = inlined_call_operand.vmem [shape: f32[1,896], index: 10, kind: input, shape index: {}]   ;;  %s4165_s11 = inlined_call_operand.vmem [shape: f32[8,2], index: 11, kind: output, shape index: {0}]   ;;  %s4166_s12 = inlined_call_operand.hbm [shape: bf16[8,896], index: 12, kind: output, shape index: {1}]  }
   0x1   :  { %19 = vsyncpa [#allocation6], 0 }
   0x2   :  { %20 = vsyncpa [#allocation9], 0 }
   0x3   :  { %21 = vsyncpa [#allocation12], 0 }
   0x4   :  { %22 = vsyncpa [#allocation15], 0  ;;  %s39_s23 = sshll.u32 %s4155_s1, 4  ;;  %s40_s23 = int_to_ptr.hbm [resolvable:$true] %s39_s23 }
   0x5   :  { %23 = vsyncpa [#allocation4], 0  ;;  %s3960_s24 = smov [#allocation5]   ;;  %s63_s28 = sshll.u32 %s4157_s3, 4  ;;  %s64_s28 = int_to_ptr.hbm [resolvable:$true] %s63_s28 }
   0x6   :  { %s41_s25 = sshll.u32 %s3960_s24, 4  ;;  %s3961_s29 = smov 128   ;;  %s42_s25 = int_to_ptr.vmem [resolvable:$true] %s41_s25 }
   0x7   :  { %s3962_s30 = smov 8   ;;  %s3963_s13 = smov [#allocation8]  }
   0x8   :  { %47 = dma.hbm_to_vmem [thread:$0]  %s40_s23, 12544, %s42_s25, [#allocation6], %s3961_s29, %s3961_s29, %s3962_s30  }
   0x9   :  { %s65_s14 = sshll.u32 %s3963_s13, 4  ;;  %s3964_s1 = smov 64   ;;  %s66_s14 = int_to_ptr.vmem [resolvable:$true] %s65_s14 }
   0xa   :  { %s3965_s15 = smov 4   ;;  %s87_s18 = sshll.u32 %s4159_s5, 4  ;;  %s88_s18 = int_to_ptr.hbm [resolvable:$true] %s87_s18 }
   0xb   :  { %71 = dma.hbm_to_vmem [thread:$0]  %s64_s28, 2048, %s66_s14, [#allocation9], %s3964_s1, %s3964_s1, %s3965_s15  }
   0xc   :  { %s3966_s19 = smov [#allocation11]   ;;  %s116_s22 = sshll.u32 %s4162_s8, 4  ;;  %s117_s22 = int_to_ptr.hbm [resolvable:$true] %s116_s22 }
   0xd   :  { %s89_s3 = sshll.u32 %s3966_s19, 4  ;;  %s3967_s23 = smov [#allocation14]   ;;  %s90_s3 = int_to_ptr.vmem [resolvable:$true] %s89_s3 }
   0xe   :  { %95 = dma.hbm_to_vmem [thread:$0]  %s88_s18, 2048, %s90_s3, [#allocation12], %s3961_s29, %s3961_s29, %s3962_s30  }
   0xf   :  { %s118_s24 = sshll.u32 %s3967_s23, 4  ;;  %s29_s27 = sshll.u32 %s4154_s0, 4  ;;  %s119_s24 = int_to_ptr.vmem [resolvable:$true] %s118_s24  ;;  %s30_s27 = int_to_ptr.hbm [resolvable:$true] %s29_s27 }
  0x10   :  { %121 = dma.hbm_to_vmem [thread:$0]  %s117_s22, 32, %s119_s24, [#allocation15]  }
  0x11   :  { %s53_s13 = sshll.u32 %s4156_s2, 4  ;;  %s3968_s14 = smov [#allocation2]   ;;  %s54_s13 = int_to_ptr.hbm [resolvable:$true] %s53_s13 }
  0x12   :  { %s31_s8 = sshll.u32 %s3968_s14, 4  ;;  %s3969_s1 = smov [#allocation7]   ;;  %s32_s8 = int_to_ptr.vmem [resolvable:$true] %s31_s8 }
  0x13   :  { %34 = dma.hbm_to_vmem [thread:$0]  %s30_s27, 448, %s32_s8, [#allocation3]  }
  0x14   :  { %s55_s15 = sshll.u32 %s3969_s1, 4  ;;  %s77_s18 = sshll.u32 %s4158_s4, 4  ;;  %s56_s15 = int_to_ptr.vmem [resolvable:$true] %s55_s15  ;;  %s78_s18 = int_to_ptr.hbm [resolvable:$true] %s77_s18 }
  0x15   :  { %58 = dma.hbm_to_vmem [thread:$0]  %s54_s13, 32, %s56_s15, [#allocation6]  }
  0x16   :  { %s102_s3 = sshll.u32 %s4161_s7, 4  ;;  %s3970_s20 = smov [#allocation10]   ;;  %s103_s3 = int_to_ptr.hbm [resolvable:$true] %s102_s3 }
  0x17   :  { %s79_s2 = sshll.u32 %s3970_s20, 4  ;;  %s3971_s21 = smov [#allocation13]   ;;  %s80_s2 = int_to_ptr.vmem [resolvable:$true] %s79_s2 }
  0x18   :  { %82 = dma.hbm_to_vmem [thread:$0]  %s78_s18, 16, %s80_s2, [#allocation9]  }
  0x19   :  { %s104_s22 = sshll.u32 %s3971_s21, 4  ;;  %s126_s25 = sshll.u32 %s4163_s9, 4  ;;  %s105_s22 = int_to_ptr.vmem [resolvable:$true] %s104_s22  ;;  %s127_s25 = int_to_ptr.hbm [resolvable:$true] %s126_s25 }
  0x1a   :  { %110 = dma.hbm_to_vmem [thread:$0]  %s103_s3, 2048, %s105_s22, [#allocation12], %s3961_s29, %s3961_s29, %s3962_s30  }
  0x1b   :  { %s3972_s4 = smov [#allocation16]   ;;  %s3973_s7 = smov 448  }
  0x1c   :  { %s128_s26 = sshll.u32 %s3972_s4, 4  ;;  %s3974_s27 = smov 28   ;;  %s129_s26 = int_to_ptr.vmem [resolvable:$true] %s128_s26 }
  0x1d   :  { %134 = dma.hbm_to_vmem [thread:$0]  %s127_s25, 14336, %s129_s26, [#allocation15], %s3973_s7, %s3973_s7, %s3974_s27  }
  0x1e   :  { %3948 = dma.done.wait [#allocation3], 448  }
  0x1f   :  { %3949 = vsyncadd [#allocation3], 4294966848 }
  0x20   :  { %3950 = dma.done.wait [#allocation6], 12576  }
  0x21   :  { %3951 = vsyncadd [#allocation6], 4294954720 }
  0x22   :  { %3952 = dma.done.wait [#allocation9], 2064  }
  0x23   :  { %3953 = vsyncadd [#allocation9], 4294965232 }
  0x24   :  { %3954 = dma.done.wait [#allocation12], 4096  }
  0x25   :  { %3955 = vsyncadd [#allocation12], 4294963200 }
  0x26   :  { %3956 = dma.done.wait [#allocation15], 14368  }
  0x27   :  { %3957 = vsyncadd [#allocation15], 4294952928  ;;  %v2431_v0 = vld [vmem:[#allocation5 + $0x70] sm:$0xf]  ;;  %v3422_v1 = vld [vmem:[#allocation5 + $0x74] sm:$0xf0] }
  0x28   :  { %v2559_v2 = vld [vmem:[#allocation5 + $0x170] sm:$0xf]  ;;  %v2432_v3 = vor.u32 %v3422_v1, %v2431_v0  ;;  %v3454_v4 = vld [vmem:[#allocation5 + $0x174] sm:$0xf0]  ;;  %v2423_v11 = vld [vmem:[#allocation5 + $0x60] sm:$0xf] }
  0x29   :  { %v2623_v5 = vld [vmem:[#allocation5 + $0x1f0] sm:$0xf]  ;;  %v3470_v6 = vld [vmem:[#allocation5 + $0x1f4] sm:$0xf0]  ;;  %v2560_v7 = vor.u32 %v3454_v4, %v2559_v2  ;;  %v3420_v13 = vld [vmem:[#allocation5 + $0x64] sm:$0xf0] }
  0x2a   :  { %v2624_v8 = vor.u32 %v3470_v6, %v2623_v5  ;;  %v2495_v9 = vld [vmem:[#allocation5 + $0xf0] sm:$0xf]  ;;  %v3438_v10 = vld [vmem:[#allocation5 + $0xf4] sm:$0xf0]  ;;  %800 = vmatpush.bf16.msra.mxu0 %v2432_v3  ;;  %v2551_v14 = vld [vmem:[#allocation5 + $0x160] sm:$0xf]  ;;  %v2424_v16 = vor.u32 %v3420_v13, %v2423_v11 }
  0x2b   :  { %v2496_v12 = vor.u32 %v3438_v10, %v2495_v9  ;;  %v3452_v15 = vld [vmem:[#allocation5 + $0x164] sm:$0xf0]  ;;  %826 = vmatpush.bf16.msra.mxu2 %v2560_v7  ;;  %v2615_v18 = vld [vmem:[#allocation5 + $0x1e0] sm:$0xf]  ;;  %v2415_v23 = vld [vmem:[#allocation5 + $0x50] sm:$0xf] }
  0x2c   :  { %839 = vmatpush.bf16.msra.mxu3 %v2624_v8  ;;  %v2552_v17 = vor.u32 %v3452_v15, %v2551_v14  ;;  %v3468_v19 = vld [vmem:[#allocation5 + $0x1e4] sm:$0xf0]  ;;  %v2487_v20 = vld [vmem:[#allocation5 + $0xe0] sm:$0xf]  ;;  %v3418_v24 = vld [vmem:[#allocation5 + $0x54] sm:$0xf0] }
  0x2d   :  { %813 = vmatpush.bf16.msra.mxu1 %v2496_v12  ;;  %v2616_v21 = vor.u32 %v3468_v19, %v2615_v18  ;;  %v3436_v22 = vld [vmem:[#allocation5 + $0xe4] sm:$0xf0]  ;;  %v2543_v26 = vld [vmem:[#allocation5 + $0x150] sm:$0xf]  ;;  %v3450_v27 = vld [vmem:[#allocation5 + $0x154] sm:$0xf0]  ;;  %v2416_v29 = vor.u32 %v3418_v24, %v2415_v23 }
  0x2e   :  { %v2488_v25 = vor.u32 %v3436_v22, %v2487_v20  ;;  %v2607_v28 = vld [vmem:[#allocation5 + $0x1d0] sm:$0xf]  ;;  %801 = vmatpush.bf16.msra.mxu0 %v2424_v16  ;;  %v3466_v30 = vld [vmem:[#allocation5 + $0x1d4] sm:$0xf0]  ;;  %v2544_v33 = vor.u32 %v3450_v27, %v2543_v26  ;;  %v2407_v35 = vld [vmem:[#allocation5 + $0x40] sm:$0xf] }
  0x2f   :  { %v2479_v31 = vld [vmem:[#allocation5 + $0xd0] sm:$0xf]  ;;  %v3434_v32 = vld [vmem:[#allocation5 + $0xd4] sm:$0xf0]  ;;  %827 = vmatpush.bf16.msra.mxu2 %v2552_v17  ;;  %v2608_v34 = vor.u32 %v3466_v30, %v2607_v28  ;;  %v3416_v36 = vld [vmem:[#allocation5 + $0x44] sm:$0xf0] }
  0x30   :  { %840 = vmatpush.bf16.msra.mxu3 %v2616_v21  ;;  %v2535_v37 = vld [vmem:[#allocation5 + $0x140] sm:$0xf]  ;;  %v2480_v38 = vor.u32 %v3434_v32, %v2479_v31  ;;  %v3448_v39 = vld [vmem:[#allocation5 + $0x144] sm:$0xf0]  ;;  %v2408_v44 = vor.u32 %v3416_v36, %v2407_v35  ;;  %v2399_v47 = vld [vmem:[#allocation5 + $0x30] sm:$0xf] }
  0x31   :  { %814 = vmatpush.bf16.msra.mxu1 %v2488_v25  ;;  %v2599_v40 = vld [vmem:[#allocation5 + $0x1c0] sm:$0xf]  ;;  %v3464_v41 = vld [vmem:[#allocation5 + $0x1c4] sm:$0xf0]  ;;  %v2536_v45 = vor.u32 %v3448_v39, %v2535_v37  ;;  %v3414_v48 = vld [vmem:[#allocation5 + $0x34] sm:$0xf0] }
  0x32   :  { %v2471_v42 = vld [vmem:[#allocation5 + $0xc0] sm:$0xf]  ;;  %v3432_v43 = vld [vmem:[#allocation5 + $0xc4] sm:$0xf0]  ;;  %802 = vmatpush.bf16.msra.mxu0 %v2416_v29  ;;  %v2600_v46 = vor.u32 %v3464_v41, %v2599_v40  ;;  %v2527_v49 = vld [vmem:[#allocation5 + $0x130] sm:$0xf]  ;;  %v2400_v56 = vor.u32 %v3414_v48, %v2399_v47 }
  0x33   :  { %828 = vmatpush.bf16.msra.mxu2 %v2544_v33  ;;  %v2472_v50 = vor.u32 %v3432_v43, %v2471_v42  ;;  %v3446_v51 = vld [vmem:[#allocation5 + $0x134] sm:$0xf0]  ;;  %v2591_v52 = vld [vmem:[#allocation5 + $0x1b0] sm:$0xf]  ;;  %v2391_v59 = vld [vmem:[#allocation5 + $0x20] sm:$0xf] }
  0x34   :  { %841 = vmatpush.bf16.msra.mxu3 %v2608_v34  ;;  %v3462_v53 = vld [vmem:[#allocation5 + $0x1b4] sm:$0xf0]  ;;  %v2463_v54 = vld [vmem:[#allocation5 + $0xb0] sm:$0xf]  ;;  %v2528_v57 = vor.u32 %v3446_v51, %v2527_v49  ;;  %v3412_v60 = vld [vmem:[#allocation5 + $0x24] sm:$0xf0] }
  0x35   :  { %815 = vmatpush.bf16.msra.mxu1 %v2480_v38  ;;  %v3430_v55 = vld [vmem:[#allocation5 + $0xb4] sm:$0xf0]  ;;  %v2592_v58 = vor.u32 %v3462_v53, %v2591_v52  ;;  %v2519_v61 = vld [vmem:[#allocation5 + $0x120] sm:$0xf]  ;;  %v3444_v63 = vld [vmem:[#allocation5 + $0x124] sm:$0xf0]  ;;  %v2392_v4 = vor.u32 %v3412_v60, %v2391_v59 }
  0x36   :  { %803 = vmatpush.bf16.msra.mxu0 %v2408_v44  ;;  %v2464_v62 = vor.u32 %v3430_v55, %v2463_v54  ;;  %v2583_v0 = vld [vmem:[#allocation5 + $0x1a0] sm:$0xf]  ;;  %v3460_v1 = vld [vmem:[#allocation5 + $0x1a4] sm:$0xf0]  ;;  %v2520_v5 = vor.u32 %v3444_v63, %v2519_v61  ;;  %v2383_v7 = vld [vmem:[#allocation5 + $0x10] sm:$0xf] }
  0x37   :  { %829 = vmatpush.bf16.msra.mxu2 %v2536_v45  ;;  %v2455_v2 = vld [vmem:[#allocation5 + $0xa0] sm:$0xf]  ;;  %v3428_v3 = vld [vmem:[#allocation5 + $0xa4] sm:$0xf0]  ;;  %v2584_v6 = vor.u32 %v3460_v1, %v2583_v0  ;;  %v3410_v8 = vld [vmem:[#allocation5 + $0x14] sm:$0xf0] }
  0x38   :  { %842 = vmatpush.bf16.msra.mxu3 %v2600_v46  ;;  %v2511_v9 = vld [vmem:[#allocation5 + $0x110] sm:$0xf]  ;;  %v2456_v10 = vor.u32 %v3428_v3, %v2455_v2  ;;  %v3442_v11 = vld [vmem:[#allocation5 + $0x114] sm:$0xf0]  ;;  %v2375_v16 = vld [vmem:[#allocation5] sm:$0xf]  ;;  %v2384_v17 = vor.u32 %v3410_v8, %v2383_v7 }
  0x39   :  { %816 = vmatpush.bf16.msra.mxu1 %v2472_v50  ;;  %v2575_v12 = vld [vmem:[#allocation5 + $0x190] sm:$0xf]  ;;  %v3458_v13 = vld [vmem:[#allocation5 + $0x194] sm:$0xf0]  ;;  %v3408_v18 = vld [vmem:[#allocation5 + $0x4] sm:$0xf0]  ;;  %v2512_v21 = vor.u32 %v3442_v11, %v2511_v9 }
  0x3a   :  { %804 = vmatpush.bf16.msra.mxu0 %v2400_v56  ;;  %v2447_v14 = vld [vmem:[#allocation5 + $0x90] sm:$0xf]  ;;  %v3426_v15 = vld [vmem:[#allocation5 + $0x94] sm:$0xf0]  ;;  %v2503_v19 = vld [vmem:[#allocation5 + $0x100] sm:$0xf]  ;;  %v2576_v22 = vor.u32 %v3458_v13, %v2575_v12  ;;  %v2376_v33 = vor.u32 %v3408_v18, %v2375_v16 }
  0x3b   :  { %830 = vmatpush.bf16.msra.mxu2 %v2528_v57  ;;  %v3440_v20 = vld [vmem:[#allocation5 + $0x104] sm:$0xf0]  ;;  %v2567_v23 = vld [vmem:[#allocation5 + $0x180] sm:$0xf]  ;;  %v175_v25 = vld [vmem:[#allocation2 + $0x8] sm:$0xff]  ;;  %v2448_v26 = vor.u32 %v3426_v15, %v2447_v14  ;;  %vm796_vm0 = vcmask 130048  }
  0x3c   :  { %843 = vmatpush.bf16.msra.mxu3 %v2592_v58  ;;  %v3456_v24 = vld [vmem:[#allocation5 + $0x184] sm:$0xf0]  ;;  %v2687_v27 = vld [vmem:[#allocation5 + $0x270] sm:$0xf]  ;;  %v3486_v28 = vld [vmem:[#allocation5 + $0x274] sm:$0xf0]  ;;  %v288_v34 = vunpack.c.l.b16 %v175_v25  ;;  %v2504_v37 = vor.u32 %v3440_v20, %v2503_v19  ;;  %v289_v53 = vunpack.c.h.b16 %v175_v25 }
  0x3d   :  { %817 = vmatpush.bf16.msra.mxu1 %v2464_v62  ;;  %v3421_v29 = vld [vmem:[#allocation5 + $0x74] sm:$0xf]  ;;  %v2433_v30 = vld [vmem:[#allocation5 + $0x78] sm:$0xf0]  ;;  %v2439_v31 = vld [vmem:[#allocation5 + $0x80] sm:$0xf]  ;;  %v2568_v38 = vor.u32 %v3456_v24, %v2567_v23  ;;  %v2688_v42 = vor.u32 %v3486_v28, %v2687_v27 }
  0x3e   :  { %805 = vmatpush.bf16.msra.mxu0 %v2392_v4  ;;  %v3424_v32 = vld [vmem:[#allocation5 + $0x84] sm:$0xf0]  ;;  %v2759_v35 = vld [vmem:[#allocation5 + $0x300] sm:$0xf]  ;;  %v2751_v39 = vld [vmem:[#allocation5 + $0x2f0] sm:$0xf]  ;;  %v2436_v43 = vor.u32 %v3421_v29, %v2433_v30  ;;  %v4077_v55 = vpack.c.b16 %v288_v34, %v288_v34 }
  0x3f   :  { %831 = vmatpush.bf16.msra.mxu2 %v2520_v5  ;;  %v3504_v36 = vld [vmem:[#allocation5 + $0x304] sm:$0xf0]  ;;  %v3502_v40 = vld [vmem:[#allocation5 + $0x2f4] sm:$0xf0]  ;;  %v3437_v41 = vld [vmem:[#allocation5 + $0xf4] sm:$0xf]  ;;  %v2440_v44 = vor.u32 %v3424_v32, %v2439_v31  ;;  %v4081_v5 = vpack.c.b16 %v289_v53, %v289_v53 }
  0x40   :  { %844 = vmatpush.bf16.msra.mxu3 %v2584_v6  ;;  %v2497_v45 = vld [vmem:[#allocation5 + $0xf8] sm:$0xf0]  ;;  %v2679_v46 = vld [vmem:[#allocation5 + $0x260] sm:$0xf]  ;;  %v174_v47 = vld [vmem:[#allocation2] sm:$0xff]  ;;  %v2760_v48 = vor.u32 %v3504_v36, %v2759_v35  ;;  %v2752_v56 = vor.u32 %v3502_v40, %v2751_v39  ;;  %vm1274_vm1 = vcmask 15360  }
  0x41   :  { %818 = vmatpush.bf16.msra.mxu1 %v2456_v10  ;;  %v3484_v49 = vld [vmem:[#allocation5 + $0x264] sm:$0xf0]  ;;  %v3419_v50 = vld [vmem:[#allocation5 + $0x64] sm:$0xf]  ;;  %v2425_v51 = vld [vmem:[#allocation5 + $0x68] sm:$0xf0]  ;;  %v286_v52 = vunpack.c.l.b16 %v174_v47  ;;  %v287_v54 = vunpack.c.h.b16 %v174_v47  ;;  %v2500_v57 = vor.u32 %v3437_v41, %v2497_v45 }
  0x42   :  { %806 = vmatpush.bf16.msra.mxu0 %v2384_v17  ;;  %v2743_v58 = vld [vmem:[#allocation5 + $0x2e0] sm:$0xf]  ;;  %v3500_v59 = vld [vmem:[#allocation5 + $0x2e4] sm:$0xf0]  ;;  %v2680_v61 = vor.u32 %v3484_v49, %v2679_v46  ;;  %v2428_v62 = vor.u32 %v3419_v50, %v2425_v51  ;;  %v3435_v63 = vld [vmem:[#allocation5 + $0xe4] sm:$0xf] }
  0x43   :  { %832 = vmatpush.bf16.msra.mxu2 %v2512_v21  ;;  %v4079_v60 = vpack.c.b16 %v286_v52, %v286_v52  ;;  %v2489_v0 = vld [vmem:[#allocation5 + $0xe8] sm:$0xf0]  ;;  %v2671_v1 = vld [vmem:[#allocation5 + $0x250] sm:$0xf]  ;;  %v3482_v2 = vld [vmem:[#allocation5 + $0x254] sm:$0xf0]  ;;  %v4083_v6 = vpack.c.b16 %v287_v54, %v287_v54  ;;  %v2744_v7 = vor.u32 %v3500_v59, %v2743_v58 }
  0x44   :  { %845 = vmatpush.bf16.msra.mxu3 %v2576_v22  ;;  %v3417_v3 = vld [vmem:[#allocation5 + $0x54] sm:$0xf]  ;;  %v2417_v4 = vld [vmem:[#allocation5 + $0x58] sm:$0xf0]  ;;  %v2492_v8 = vor.u32 %v3435_v63, %v2489_v0  ;;  %v2735_v9 = vld [vmem:[#allocation5 + $0x2d0] sm:$0xf]  ;;  %v2672_v11 = vor.u32 %v3482_v2, %v2671_v1 }
  0x45   :  { %819 = vmatpush.bf16.msra.mxu1 %v2448_v26  ;;  %v3498_v10 = vld [vmem:[#allocation5 + $0x2d4] sm:$0xf0]  ;;  %v2420_v12 = vor.u32 %v3417_v3, %v2417_v4  ;;  %v3433_v13 = vld [vmem:[#allocation5 + $0xd4] sm:$0xf]  ;;  %v2481_v14 = vld [vmem:[#allocation5 + $0xd8] sm:$0xf0] }
  0x46   :  { %807 = vmatpush.bf16.msra.mxu0 %v2376_v33  ;;  %v2663_v15 = vld [vmem:[#allocation5 + $0x240] sm:$0xf]  ;;  %v3480_v16 = vld [vmem:[#allocation5 + $0x244] sm:$0xf0]  ;;  %v3415_v17 = vld [vmem:[#allocation5 + $0x44] sm:$0xf]  ;;  %v2736_v19 = vor.u32 %v3498_v10, %v2735_v9  ;;  %v2484_v20 = vor.u32 %v3433_v13, %v2481_v14 }
  0x47   :  { %833 = vmatpush.bf16.msra.mxu2 %v2504_v37  ;;  %v2409_v18 = vld [vmem:[#allocation5 + $0x48] sm:$0xf0]  ;;  %v2727_v21 = vld [vmem:[#allocation5 + $0x2c0] sm:$0xf]  ;;  %v3496_v22 = vld [vmem:[#allocation5 + $0x2c4] sm:$0xf0]  ;;  %v2664_v24 = vor.u32 %v3480_v16, %v2663_v15 }
  0x48   :  { %846 = vmatpush.bf16.msra.mxu3 %v2568_v38  ;;  %v3431_v23 = vld [vmem:[#allocation5 + $0xc4] sm:$0xf]  ;;  %v2412_v25 = vor.u32 %v3415_v17, %v2409_v18  ;;  %v2473_v26 = vld [vmem:[#allocation5 + $0xc8] sm:$0xf0]  ;;  %v2655_v27 = vld [vmem:[#allocation5 + $0x230] sm:$0xf]  ;;  %v2728_v32 = vor.u32 %v3496_v22, %v2727_v21 }
  0x49   :  { %820 = vmatpush.bf16.msra.mxu1 %v2440_v44  ;;  %808 = vmatmul.bf16.vlgmr.msra.gmra.mxu0 %v4079_v60  ;;  %v3478_v28 = vld [vmem:[#allocation5 + $0x234] sm:$0xf0]  ;;  %v3413_v29 = vld [vmem:[#allocation5 + $0x34] sm:$0xf]  ;;  %v2401_v30 = vld [vmem:[#allocation5 + $0x38] sm:$0xf0]  ;;  %v2476_v34 = vor.u32 %v3431_v23, %v2473_v26 }
  0x4a   :  { %852 = vmatpush.bf16.msrb.mxu0 %v2688_v42  ;;  %834 = vmatmul.bf16.vlgmr.msra.gmra.mxu2 %v4077_v55  ;;  %v177_v31 = vld [vmem:[#allocation2 + $0x18] sm:$0xf]  ;;  %v2719_v35 = vld [vmem:[#allocation5 + $0x2b0] sm:$0xf]  ;;  %v3494_v36 = vld [vmem:[#allocation5 + $0x2b4] sm:$0xf0]  ;;  %v2656_v37 = vor.u32 %v3478_v28, %v2655_v27  ;;  %v2404_v38 = vor.u32 %v3413_v29, %v2401_v30 }
  0x4b   :  { %885 = vmatpush.bf16.msrb.mxu2 %v2760_v48  ;;  %847 = vmatmul.bf16.vlgmr.msra.gmra.mxu3 %v4081_v5  ;;  %v292_v33 = vunpack.c.l.b16 %v177_v31  ;;  %v3429_v39 = vld [vmem:[#allocation5 + $0xb4] sm:$0xf]  ;;  %v2465_v40 = vld [vmem:[#allocation5 + $0xb8] sm:$0xf0]  ;;  %v2647_v41 = vld [vmem:[#allocation5 + $0x220] sm:$0xf]  ;;  %v2720_v45 = vor.u32 %v3494_v36, %v2719_v35 }
  0x4c   :  { %891 = vmatpush.bf16.msrb.mxu3 %v2436_v43  ;;  %821 = vmatmul.bf16.vlgmr.msra.gmra.mxu1 %v4083_v6  ;;  %v3476_v42 = vld [vmem:[#allocation5 + $0x224] sm:$0xf0]  ;;  %v3411_v43 = vld [vmem:[#allocation5 + $0x24] sm:$0xf]  ;;  %v2393_v44 = vld [vmem:[#allocation5 + $0x28] sm:$0xf0]  ;;  %v2468_v47 = vor.u32 %v3429_v39, %v2465_v40 }
  0x4d   :  { %865 = vmatpush.bf16.msrb.mxu1 %v2752_v56  ;;  %v4089_v46 = vpack.c.b16 %v292_v33, %v292_v33  ;;  %v2711_v48 = vld [vmem:[#allocation5 + $0x2a0] sm:$0xf]  ;;  %v3492_v49 = vld [vmem:[#allocation5 + $0x2a4] sm:$0xf0]  ;;  %v2648_v50 = vor.u32 %v3476_v42, %v2647_v41  ;;  %v2396_v51 = vor.u32 %v3411_v43, %v2393_v44  ;;  %v3427_v52 = vld [vmem:[#allocation5 + $0xa4] sm:$0xf] }
  0x4e   :  { %853 = vmatpush.bf16.msrb.mxu0 %v2680_v61  ;;  %v2457_v53 = vld [vmem:[#allocation5 + $0xa8] sm:$0xf0]  ;;  %v2639_v54 = vld [vmem:[#allocation5 + $0x210] sm:$0xf]  ;;  %v3474_v56 = vld [vmem:[#allocation5 + $0x214] sm:$0xf0]  ;;  %v2712_v59 = vor.u32 %v3492_v49, %v2711_v48 }
  0x4f   :  { %904 = vmatpush.bf16.msra.mxu2 %v2500_v57  ;;  %v3409_v57 = vld [vmem:[#allocation5 + $0x14] sm:$0xf]  ;;  %v2385_v58 = vld [vmem:[#allocation5 + $0x18] sm:$0xf0]  ;;  %v2703_v61 = vld [vmem:[#allocation5 + $0x290] sm:$0xf]  ;;  %v2640_v2 = vor.u32 %v3474_v56, %v2639_v54 }
  0x50   :  { %892 = vmatpush.bf16.msrb.mxu3 %v2428_v62  ;;  %v2460_v62 = vor.u32 %v3427_v52, %v2457_v53  ;;  %v3490_v63 = vld [vmem:[#allocation5 + $0x294] sm:$0xf0]  ;;  %v3425_v0 = vld [vmem:[#allocation5 + $0x94] sm:$0xf]  ;;  %v2449_v1 = vld [vmem:[#allocation5 + $0x98] sm:$0xf0]  ;;  %v2388_v3 = vor.u32 %v3409_v57, %v2385_v58 }
  0x51   :  { %866 = vmatpush.bf16.msrb.mxu1 %v2744_v7  ;;  %v2631_v4 = vld [vmem:[#allocation5 + $0x200] sm:$0xf]  ;;  %v3472_v7 = vld [vmem:[#allocation5 + $0x204] sm:$0xf0]  ;;  %v3407_v9 = vld [vmem:[#allocation5 + $0x4] sm:$0xf]  ;;  %v2452_v16 = vor.u32 %v3425_v0, %v2449_v1 }
  0x52   :  { %854 = vmatpush.bf16.msrb.mxu0 %v2672_v11  ;;  %v2377_v10 = vld [vmem:[#allocation5 + $0x8] sm:$0xf0]  ;;  %v3453_v11 = vld [vmem:[#allocation5 + $0x174] sm:$0xf]  ;;  %v2561_v13 = vld [vmem:[#allocation5 + $0x178] sm:$0xf0] }
  0x53   :  { %905 = vmatpush.bf16.msra.mxu2 %v2492_v8  ;;  %v176_v8 = vld [vmem:[#allocation2 + $0x10] sm:$0xff]  ;;  %v2689_v15 = vld [vmem:[#allocation5 + $0x278] sm:$0xf0]  ;;  %v2695_v17 = vld [vmem:[#allocation5 + $0x280] sm:$0xf]  ;;  %v2380_v21 = vor.u32 %v3407_v9, %v2377_v10  ;;  %s2357_s8 = sshll.u32 %s4166_s12, 4  ;;  %s2358_s8 = int_to_ptr.hbm [resolvable:$true] %s2357_s8 }
  0x54   :  { %893 = vmatpush.bf16.msrb.mxu3 %v2420_v12  ;;  %v2704_v12 = vor.u32 %v3490_v63, %v2703_v61  ;;  %v3485_v14 = vld [vmem:[#allocation5 + $0x274] sm:$0xf]  ;;  %v3488_v18 = vld [vmem:[#allocation5 + $0x284] sm:$0xf0]  ;;  %v3423_v22 = vld [vmem:[#allocation5 + $0x84] sm:$0xf]  ;;  %v291_v30 = vunpack.c.h.b16 %v176_v8 }
  0x55   :  { %867 = vmatpush.bf16.msrb.mxu1 %v2736_v19  ;;  %v290_v19 = vunpack.c.l.b16 %v176_v8  ;;  %v2441_v23 = vld [vmem:[#allocation5 + $0x88] sm:$0xf0]  ;;  %v2692_v26 = vor.u32 %v3485_v14, %v2689_v15  ;;  %v2625_v27 = vld [vmem:[#allocation5 + $0x1f8] sm:$0xf0]  ;;  %v3501_v28 = vld [vmem:[#allocation5 + $0x2f4] sm:$0xf]  ;;  %v2696_v31 = vor.u32 %v3488_v18, %v2695_v17 }
  0x56   :  { %855 = vmatpush.bf16.msrb.mxu0 %v2664_v24  ;;  %v3469_v24 = vld [vmem:[#allocation5 + $0x1f4] sm:$0xf]  ;;  %v2753_v29 = vld [vmem:[#allocation5 + $0x2f8] sm:$0xf0]  ;;  %v2553_v33 = vld [vmem:[#allocation5 + $0x168] sm:$0xf0]  ;;  %v2444_v35 = vor.u32 %v3423_v22, %v2441_v23  ;;  %v4095_v41 = vpack.c.b16 %v291_v30, %v291_v30 }
  0x57   :  { %906 = vmatpush.bf16.msra.mxu2 %v2484_v20  ;;  %v2632_v20 = vor.u32 %v3472_v7, %v2631_v4  ;;  %v3483_v36 = vld [vmem:[#allocation5 + $0x264] sm:$0xf]  ;;  %v2756_v39 = vor.u32 %v3501_v28, %v2753_v29  ;;  %v2617_v43 = vld [vmem:[#allocation5 + $0x1e8] sm:$0xf0]  ;;  %v3449_v48 = vld [vmem:[#allocation5 + $0x154] sm:$0xf] }
  0x58   :  { %894 = vmatpush.bf16.msrb.mxu3 %v2412_v25  ;;  %v2564_v25 = vor.u32 %v3453_v11, %v2561_v13  ;;  %v3467_v40 = vld [vmem:[#allocation5 + $0x1e4] sm:$0xf]  ;;  %v2545_v49 = vld [vmem:[#allocation5 + $0x158] sm:$0xf0]  ;;  %v3465_v54 = vld [vmem:[#allocation5 + $0x1d4] sm:$0xf] }
  0x59   :  { %868 = vmatpush.bf16.msrb.mxu1 %v2728_v32  ;;  %v3451_v32 = vld [vmem:[#allocation5 + $0x164] sm:$0xf]  ;;  %v2620_v52 = vor.u32 %v3467_v40, %v2617_v43  ;;  %v2609_v56 = vld [vmem:[#allocation5 + $0x1d8] sm:$0xf0]  ;;  %v2548_v57 = vor.u32 %v3449_v48, %v2545_v49  ;;  %v3497_v58 = vld [vmem:[#allocation5 + $0x2d4] sm:$0xf] }
  0x5a   :  { %856 = vmatpush.bf16.msrb.mxu0 %v2656_v37  ;;  %2765 = vmatmul.msk.bf16.vlgmr.msrb.gmra.mxu2 %vm796_vm0, %v4089_v46  ;;  %v2681_v37 = vld [vmem:[#allocation5 + $0x268] sm:$0xf0]  ;;  %v2556_v42 = vor.u32 %v3451_v32, %v2553_v33  ;;  %v3499_v44 = vld [vmem:[#allocation5 + $0x2e4] sm:$0xf]  ;;  %v2529_v13 = vld [vmem:[#allocation5 + $0x138] sm:$0xf0] }
  0x5b   :  { %907 = vmatpush.bf16.msra.mxu2 %v2476_v34  ;;  %v4093_v34 = vpack.c.b16 %v290_v19, %v290_v19  ;;  %v2537_v63 = vld [vmem:[#allocation5 + $0x148] sm:$0xf0]  ;;  %v3479_v0 = vld [vmem:[#allocation5 + $0x244] sm:$0xf]  ;;  %v3477_v14 = vld [vmem:[#allocation5 + $0x234] sm:$0xf] }
  0x5c   :  { %895 = vmatpush.bf16.msrb.mxu3 %v2404_v38  ;;  %v2628_v38 = vor.u32 %v3469_v24, %v2625_v27  ;;  %v2665_v1 = vld [vmem:[#allocation5 + $0x248] sm:$0xf0]  ;;  %v3463_v4 = vld [vmem:[#allocation5 + $0x1c4] sm:$0xf]  ;;  %v2593_v18 = vld [vmem:[#allocation5 + $0x1b8] sm:$0xf0] }
  0x5d   :  { %869 = vmatpush.bf16.msrb.mxu1 %v2720_v45  ;;  %v2745_v45 = vld [vmem:[#allocation5 + $0x2e8] sm:$0xf0]  ;;  %v3495_v9 = vld [vmem:[#allocation5 + $0x2c4] sm:$0xf]  ;;  %v2668_v11 = vor.u32 %v3479_v0, %v2665_v1  ;;  %v3493_v19 = vld [vmem:[#allocation5 + $0x2b4] sm:$0xf] }
  0x5e   :  { %857 = vmatpush.bf16.msrb.mxu0 %v2648_v50  ;;  %v3481_v50 = vld [vmem:[#allocation5 + $0x254] sm:$0xf]  ;;  %v2748_v53 = vor.u32 %v3499_v44, %v2745_v45  ;;  %v2601_v8 = vld [vmem:[#allocation5 + $0x1c8] sm:$0xf0]  ;;  %v3443_v22 = vld [vmem:[#allocation5 + $0x124] sm:$0xf] }
  0x5f   :  { %908 = vmatpush.bf16.msra.mxu2 %v2468_v47  ;;  %v2684_v47 = vor.u32 %v3483_v36, %v2681_v37  ;;  %v2729_v10 = vld [vmem:[#allocation5 + $0x2c8] sm:$0xf0]  ;;  %v2604_v15 = vor.u32 %v3463_v4, %v2601_v8  ;;  %v3475_v24 = vld [vmem:[#allocation5 + $0x224] sm:$0xf]  ;;  %v2513_v36 = vld [vmem:[#allocation5 + $0x118] sm:$0xf0] }
  0x60   :  { %896 = vmatpush.bf16.msrb.mxu3 %v2396_v51  ;;  %v2673_v51 = vld [vmem:[#allocation5 + $0x258] sm:$0xf0]  ;;  %v2521_v23 = vld [vmem:[#allocation5 + $0x128] sm:$0xf0]  ;;  %v3459_v28 = vld [vmem:[#allocation5 + $0x1a4] sm:$0xf] }
  0x61   :  { %870 = vmatpush.bf16.msrb.mxu1 %v2712_v59  ;;  %v2737_v59 = vld [vmem:[#allocation5 + $0x2d8] sm:$0xf0]  ;;  %v2676_v61 = vor.u32 %v3481_v50, %v2673_v51  ;;  %v2524_v29 = vor.u32 %v3443_v22, %v2521_v23  ;;  %v2585_v30 = vld [vmem:[#allocation5 + $0x1a8] sm:$0xf0]  ;;  %v3473_v37 = vld [vmem:[#allocation5 + $0x214] sm:$0xf] }
  0x62   :  { %858 = vmatpush.bf16.msrb.mxu0 %v2640_v2  ;;  %v2612_v2 = vor.u32 %v3465_v54, %v2609_v56  ;;  %v2713_v32 = vld [vmem:[#allocation5 + $0x2a8] sm:$0xf0]  ;;  %v2577_v44 = vld [vmem:[#allocation5 + $0x198] sm:$0xf0]  ;;  %v3489_v45 = vld [vmem:[#allocation5 + $0x294] sm:$0xf] }
  0x63   :  { %909 = vmatpush.bf16.msra.mxu2 %v2460_v62  ;;  %v3447_v62 = vld [vmem:[#allocation5 + $0x144] sm:$0xf]  ;;  %v2505_v50 = vld [vmem:[#allocation5 + $0x108] sm:$0xf0]  ;;  %v3510_v8 = vld [vmem:[#allocation8 + $0x28] sm:$0xff] }
  0x64   :  { %897 = vmatpush.bf16.msrb.mxu3 %v2388_v3  ;;  %v2740_v3 = vor.u32 %v3497_v58, %v2737_v59  ;;  %v2540_v7 = vor.u32 %v3447_v62, %v2537_v63  ;;  %v3439_v49 = vld [vmem:[#allocation5 + $0x104] sm:$0xf]  ;;  %v2761_v54 = vld [vmem:[#allocation5 + $0x308] sm:$0xf0] }
  0x65   :  { %871 = vmatpush.bf16.msrb.mxu1 %v2704_v12  ;;  %v3445_v12 = vld [vmem:[#allocation5 + $0x134] sm:$0xf]  ;;  %v3471_v51 = vld [vmem:[#allocation5 + $0x204] sm:$0xf]  ;;  %v2508_v58 = vor.u32 %v3439_v49, %v2505_v50  ;;  %v2697_v0 = vld [vmem:[#allocation5 + $0x288] sm:$0xf0] }
  0x66   :  { %859 = vmatpush.bf16.msrb.mxu0 %v2632_v20  ;;  %v2532_v17 = vor.u32 %v3445_v12, %v2529_v13  ;;  %v2721_v20 = vld [vmem:[#allocation5 + $0x2b8] sm:$0xf0]  ;;  %v3455_v59 = vld [vmem:[#allocation5 + $0x184] sm:$0xf]  ;;  %v3512_v4 = vld [vmem:[#allocation8 + $0x38] sm:$0xff] }
  0x67   :  { %910 = vmatpush.bf16.msra.mxu2 %v2452_v16  ;;  %v3461_v16 = vld [vmem:[#allocation5 + $0x1b4] sm:$0xf]  ;;  %v2724_v27 = vor.u32 %v3493_v19, %v2721_v20  ;;  %v3487_v63 = vld [vmem:[#allocation5 + $0x284] sm:$0xf] }
  0x68   :  { %898 = vmatpush.bf16.msrb.mxu3 %v2380_v21  ;;  %v3519_v22 = vld [vmem:[#allocation8 + $0x70] sm:$0xff] }
  0x69   :  { %872 = vmatpush.bf16.msrb.mxu1 %v2696_v31  ;;  %860 = vmatmul.bf16.vlgmr.msrb.gmra.mxu0 %v4093_v34  ;;  %v3491_v31 = vld [vmem:[#allocation5 + $0x2a4] sm:$0xf] }
  0x6a   :  { %917 = vmatpush.bf16.msra.mxu0 %v2564_v25  ;;  %v2649_v25 = vld [vmem:[#allocation5 + $0x228] sm:$0xf0]  ;;  %v2716_v40 = vor.u32 %v3491_v31, %v2713_v32  ;;  %v3517_v31 = vld [vmem:[#allocation8 + $0x60] sm:$0xff] }
  0x6b   :  { %911 = vmatpush.bf16.msra.mxu2 %v2444_v35  ;;  %899 = vmatmul.bf16.vlgmr.msrb.gmra.mxu3 %v4079_v60  ;;  %v2732_v60 = vor.u32 %v3495_v9, %v2729_v10  ;;  %v2652_v33 = vor.u32 %v3475_v24, %v2649_v25  ;;  %v3441_v35 = vld [vmem:[#allocation5 + $0x114] sm:$0xf]  ;;  %v3508_v10 = vld [vmem:[#allocation8 + $0x18] sm:$0xff] }
  0x6c   :  { %943 = vmatpush.bf16.msra.mxu3 %v2692_v26  ;;  %873 = vmatmul.bf16.vlgmr.msrb.gmra.mxu1 %v4095_v41  ;;  %v2596_v26 = vor.u32 %v3461_v16, %v2593_v18  ;;  %v2516_v43 = vor.u32 %v3441_v35, %v2513_v36  ;;  %v3509_v9 = vld [vmem:[#allocation8 + $0x20] sm:$0xff]  ;;  %v3520_v16 = vld [vmem:[#allocation8 + $0x78] sm:$0xff] }
  0x6d   :  { %930 = vmatpush.bf16.msra.mxu1 %v2628_v38  ;;  %v2641_v38 = vld [vmem:[#allocation5 + $0x218] sm:$0xf0] }
  0x6e   :  { %918 = vmatpush.bf16.msra.mxu0 %v2556_v42  ;;  %912 = vmatmul.bf16.vlgmr.msra.gmra.mxu2 %v4083_v6  ;;  %v2657_v6 = vld [vmem:[#allocation5 + $0x238] sm:$0xf0]  ;;  %v3457_v42 = vld [vmem:[#allocation5 + $0x194] sm:$0xf]  ;;  %v2644_v48 = vor.u32 %v3473_v37, %v2641_v38 }
  0x6f   :  { %956 = vmatpush.bf16.msrb.mxu2 %v2756_v39  ;;  %v2660_v21 = vor.u32 %v3477_v14, %v2657_v6  ;;  %v2588_v39 = vor.u32 %v3459_v28, %v2585_v30  ;;  %v2580_v56 = vor.u32 %v3457_v42, %v2577_v44  ;;  %v3505_v14 = vld [vmem:[#allocation8] sm:$0xff] }
  0x70   :  { %944 = vmatpush.bf16.msra.mxu3 %v2684_v47  ;;  %v2705_v47 = vld [vmem:[#allocation5 + $0x298] sm:$0xf0] }
  0x71   :  { %931 = vmatpush.bf16.msra.mxu1 %v2620_v52  ;;  %v2633_v52 = vld [vmem:[#allocation5 + $0x208] sm:$0xf0] }
  0x72   :  { %919 = vmatpush.bf16.msra.mxu0 %v2548_v57  ;;  %v2708_v57 = vor.u32 %v3489_v45, %v2705_v47  ;;  %v2636_v62 = vor.u32 %v3471_v51, %v2633_v52  ;;  %v3513_v45 = vld [vmem:[#allocation8 + $0x40] sm:$0xff] }
  0x73   :  { %957 = vmatpush.bf16.msrb.mxu2 %v2748_v53  ;;  %v3503_v53 = vld [vmem:[#allocation5 + $0x304] sm:$0xf] }
  0x74   :  { %945 = vmatpush.bf16.msra.mxu3 %v2676_v61  ;;  %v2569_v61 = vld [vmem:[#allocation5 + $0x188] sm:$0xf0]  ;;  %v2764_v1 = vor.u32 %v3503_v53, %v2761_v54 }
  0x75   :  { %932 = vmatpush.bf16.msra.mxu1 %v2612_v2  ;;  %v2572_v2 = vor.u32 %v3455_v59, %v2569_v61 }
  0x76   :  { %920 = vmatpush.bf16.msra.mxu0 %v2540_v7  ;;  %v3511_v7 = vld [vmem:[#allocation8 + $0x30] sm:$0xff] }
  0x77   :  { %958 = vmatpush.bf16.msrb.mxu2 %v2740_v3  ;;  %v2700_v3 = vor.u32 %v3487_v63, %v2697_v0 }
  0x78   :  { %946 = vmatpush.bf16.msra.mxu3 %v2668_v11 }
  0x79   :  { %933 = vmatpush.bf16.msra.mxu1 %v2604_v15 }
  0x7a   :  { %921 = vmatpush.bf16.msra.mxu0 %v2532_v17 }
  0x7b   :  { %959 = vmatpush.bf16.msrb.mxu2 %v2732_v60 }
  0x7c   :  { %947 = vmatpush.bf16.msra.mxu3 %v2660_v21 }
  0x7d   :  { %934 = vmatpush.bf16.msra.mxu1 %v2596_v26 }
  0x7e   :  { %922 = vmatpush.bf16.msra.mxu0 %v2524_v29 }
  0x7f   :  { %960 = vmatpush.bf16.msrb.mxu2 %v2724_v27  ;;  %v3518_v27 = vld [vmem:[#allocation8 + $0x68] sm:$0xff] }
  0x80   :  { %948 = vmatpush.bf16.msra.mxu3 %v2652_v33  ;;  %v3516_v33 = vld [vmem:[#allocation8 + $0x58] sm:$0xff] }
  0x81   :  { %935 = vmatpush.bf16.msra.mxu1 %v2588_v39  ;;  %v3515_v39 = vld [vmem:[#allocation8 + $0x50] sm:$0xff] }
  0x82   :  { %923 = vmatpush.bf16.msra.mxu0 %v2516_v43  ;;  %v3514_v43 = vld [vmem:[#allocation8 + $0x48] sm:$0xff] }
  0x83   :  { %961 = vmatpush.bf16.msrb.mxu2 %v2716_v40 }
  0x84   :  { %949 = vmatpush.bf16.msra.mxu3 %v2644_v48 }
  0x85   :  { %936 = vmatpush.bf16.msra.mxu1 %v2580_v56 }
  0x86   :  { %924 = vmatpush.bf16.msra.mxu0 %v2508_v58 }
  0x87   :  { %962 = vmatpush.bf16.msrb.mxu2 %v2708_v57 }
  0x88   :  { %950 = vmatpush.bf16.msra.mxu3 %v2636_v62 }
  0x89   :  { %937 = vmatpush.bf16.msra.mxu1 %v2572_v2  ;;  %925 = vmatmul.bf16.vlgmr.msra.gmra.mxu0 %v4077_v55 }
  0x8a   :  { %976 = vmatpush.bf16.msrb.mxu0 %v2764_v1 }
  0x8b   :  { %951 = vmatmul.bf16.vlgmr.msra.gmra.mxu3 %v4093_v34  ;;  %963 = vmatpush.bf16.msrb.mxu2 %v2700_v3  ;;  %v3507_v34 = vld [vmem:[#allocation8 + $0x10] sm:$0xff] }
  0x8c   :  { %938 = vmatmul.bf16.vlgmr.msra.gmra.mxu1 %v4081_v5  ;;  %v3506_v5 = vld [vmem:[#allocation8 + $0x8] sm:$0xff]  ;;  %1131 = vmatpush.bf16.msrb.mxu3 %v3520_v16 }
  0x8d   :  { %1118 = vmatpush.bf16.msrb.mxu1 %v3512_v4 }
  0x8e   :  { %964 = vmatmul.bf16.vlgmr.msrb.gmra.mxu2 %v4095_v41  ;;  %v276_v41 = vld [vmem:[#allocation7] sm:$0x3] }
  0x8f   :  { %v278_v15 = vperm.slane %v276_v41, 0  ;;  %v279_v47 = vperm.slane %v276_v41, 1  ;;  %v2883_v41 = vld [vmem:[#allocation11 + $0x68] sm:$0xf0] }
  0x90   :  { %1132 = vmatpush.bf16.msrb.mxu3 %v3519_v22 }
  0x91   :  { %1119 = vmatpush.bf16.msrb.mxu1 %v3511_v7  ;;  %v2889_v7 = vld [vmem:[#allocation11 + $0x70] sm:$0xf] }
  0x94   :  { %1133 = vmatpush.bf16.msrb.mxu3 %v3518_v27  ;;  %v2859_v27 = vld [vmem:[#allocation11 + $0x38] sm:$0xf0] }
  0x95   :  { %1120 = vmatpush.bf16.msrb.mxu1 %v3510_v8  ;;  %v3536_v8 = vld [vmem:[#allocation11 + $0x74] sm:$0xf0] }
  0x98   :  { %1134 = vmatpush.bf16.msrb.mxu3 %v3517_v31 }
  0x99   :  { %2766 = vmatmul.msk.bf16.vlgmr.msrb.gmra.mxu0 %vm796_vm0, %v4089_v46  ;;  %1121 = vmatpush.bf16.msrb.mxu1 %v3509_v9  ;;  %v3535_v9 = vld [vmem:[#allocation11 + $0x74] sm:$0xf] }
  0x9c   :  { %1135 = vmatpush.bf16.msrb.mxu3 %v3516_v33  ;;  %v3526_v33 = vld [vmem:[#allocation11 + $0x24] sm:$0xf0] }
  0x9d   :  { %1122 = vmatpush.bf16.msrb.mxu1 %v3508_v10  ;;  %v2890_v10 = vor.u32 %v3536_v8, %v2889_v7  ;;  %v3547_v7 = vld [vmem:[#allocation13 + $0x54] sm:$0xf]  ;;  %v2939_v8 = vld [vmem:[#allocation13 + $0x58] sm:$0xf0] }
  0x9f   :  { %1248 = vmatpush.bf16.msra.mxu0 %v2890_v10  ;;  %v2942_v10 = vor.u32 %v3547_v7, %v2939_v8  ;;  %v3654_v7 = vld [vmem:[#allocation16 + $0x328] sm:$0xf0] }
  0xa0   :  { %1136 = vmatpush.bf16.msrb.mxu3 %v3515_v39  ;;  %v2841_v39 = vld [vmem:[#allocation11 + $0x10] sm:$0xf] }
  0xa1   :  { %1123 = vmatpush.bf16.msrb.mxu1 %v3507_v34  ;;  %v2881_v34 = vld [vmem:[#allocation11 + $0x60] sm:$0xf] }
  0xa4   :  { %1137 = vmatpush.bf16.msrb.mxu3 %v3514_v43 }
  0xa5   :  { %1124 = vmatpush.bf16.msrb.mxu1 %v3506_v5 }
  0xa8   :  { %1138 = vmatpush.bf16.msrb.mxu3 %v3513_v45 }
  0xa9   :  { %1125 = vmatpush.bf16.msrb.mxu1 %v3505_v14  ;;  %v2873_v14 = vld [vmem:[#allocation11 + $0x50] sm:$0xf] }
  0xc6   :  { %v809_v55 = vpop.f32.mrf.mxu0 }
  0xc7   :  { %v810_v17 = vadd.f32 %v809_v55, %v278_v15  ;;  %v2891_v55 = vld [vmem:[#allocation11 + $0x78] sm:$0xf0]  ;;  %v3531_v15 = vld [vmem:[#allocation11 + $0x54] sm:$0xf] }
  0xc8   :  { %v2894_v5 = vor.u32 %v3535_v9, %v2891_v55  ;;  %v2929_v55 = vld [vmem:[#allocation13 + $0x40] sm:$0xf] }
  0xc9   :  { %v822_v11 = vpop.f32.mrf.mxu1 }
  0xca   :  { %v823_v19 = vadd.f32 %v822_v11, %v810_v17  ;;  %v3534_v11 = vld [vmem:[#allocation11 + $0x64] sm:$0xf0]  ;;  %1261 = vmatpush.bf16.msra.mxu2 %v2894_v5  ;;  %v2931_v5 = vld [vmem:[#allocation13 + $0x48] sm:$0xf0] }
  0xcd   :  { %v835_v12 = vpop.f32.mrf.mxu2 }
  0xce   :  { %v848_v13 = vpop.f32.mrf.mxu3  ;;  %v811_v46 = vpop.f32.mrf.mxu0  ;;  %v836_v21 = vadd.f32 %v835_v12, %v823_v19  ;;  %v3533_v12 = vld [vmem:[#allocation11 + $0x64] sm:$0xf]  ;;  %v3530_v19 = vld [vmem:[#allocation11 + $0x44] sm:$0xf0] }
  0xcf   :  { %v2886_v46 = vor.u32 %v3533_v12, %v2883_v41 }
  0xd0   :  { %v849_v23 = vadd.f32 %v848_v13, %v836_v21  ;;  %v2882_v13 = vor.u32 %v3534_v11, %v2881_v34  ;;  %v2867_v21 = vld [vmem:[#allocation11 + $0x48] sm:$0xf0]  ;;  %v3546_v34 = vld [vmem:[#allocation13 + $0x44] sm:$0xf0]  ;;  %v3545_v11 = vld [vmem:[#allocation13 + $0x44] sm:$0xf] }
  0xd1   :  { %v824_v6 = vpop.f32.mrf.mxu1  ;;  %1262 = vmatpush.bf16.msra.mxu2 %v2886_v46  ;;  %v2930_v12 = vor.u32 %v3546_v34, %v2929_v55  ;;  %v2934_v41 = vor.u32 %v3545_v11, %v2931_v5  ;;  %v3544_v46 = vld [vmem:[#allocation13 + $0x34] sm:$0xf0]  ;;  %v3073_v11 = vld [vmem:[#allocation16 + $0xe0] sm:$0xf]  ;;  %v3584_v5 = vld [vmem:[#allocation16 + $0xf8] sm:$0xf0] }
  0xd2   :  { %v3532_v6 = vld [vmem:[#allocation11 + $0x54] sm:$0xf0]  ;;  %1249 = vmatpush.bf16.msra.mxu0 %v2882_v13  ;;  %v2921_v13 = vld [vmem:[#allocation13 + $0x30] sm:$0xf] }
  0xd3   :  { %v2874_v16 = vor.u32 %v3532_v6, %v2873_v14  ;;  %v3543_v14 = vld [vmem:[#allocation13 + $0x34] sm:$0xf]  ;;  %v2923_v6 = vld [vmem:[#allocation13 + $0x38] sm:$0xf0] }
  0xd5   :  { %v837_v60 = vpop.f32.mrf.mxu2 }
  0xd6   :  { %v850_v18 = vpop.f32.mrf.mxu3  ;;  %v2875_v60 = vld [vmem:[#allocation11 + $0x58] sm:$0xf0]  ;;  %1250 = vmatpush.bf16.msra.mxu0 %v2874_v16  ;;  %v2926_v16 = vor.u32 %v3543_v14, %v2923_v6  ;;  %v3581_v14 = vld [vmem:[#allocation16 + $0xe4] sm:$0xf]  ;;  %v3075_v6 = vld [vmem:[#allocation16 + $0xfc] sm:$0xf0] }
  0xd7   :  { %v2878_v17 = vor.u32 %v3531_v15, %v2875_v60  ;;  %v2865_v18 = vld [vmem:[#allocation11 + $0x40] sm:$0xf]  ;;  %v3681_v15 = vld [vmem:[#allocation10] ss:$0 sm:$0xff]  ;;  %v2922_v60 = vor.u32 %v3544_v46, %v2921_v13  ;;  %v3647_v13 = vld [vmem:[#allocation16 + $0x2f0] sm:$0xf0] }
  0xd8   :  { %v2866_v22 = vor.u32 %v3530_v19, %v2865_v18  ;;  %v3644_v46 = vld [vmem:[#allocation16 + $0x2dc] sm:$0xf] }
  0xd9   :  { %1263 = vmatpush.bf16.msra.mxu2 %v2878_v17 }
  0xda   :  { %1251 = vmatpush.bf16.msra.mxu0 %v2866_v22 }
  0xdd   :  { %v887_v20 = vpop.f32.mrf.mxu2 }
  0xe5   :  { %v889_v26 = vpop.f32.mrf.mxu2 }
  0xe6   :  { %v861_v24 = vpop.f32.mrf.mxu0  ;;  %v3527_v26 = vld [vmem:[#allocation11 + $0x34] sm:$0xf] }
  0xe7   :  { %v862_v25 = vadd.f32 %v861_v24, %v849_v23  ;;  %v2857_v24 = vld [vmem:[#allocation11 + $0x30] sm:$0xf] }
  0xe9   :  { %v874_v28 = vpop.f32.mrf.mxu1 }
  0xea   :  { %v875_v29 = vadd.f32 %v874_v28, %v862_v25  ;;  %v3528_v25 = vld [vmem:[#allocation11 + $0x34] sm:$0xf0] }
  0xeb   :  { %v2858_v28 = vor.u32 %v3528_v25, %v2857_v24  ;;  %v3542_v24 = vld [vmem:[#allocation13 + $0x24] sm:$0xf0]  ;;  %v3541_v25 = vld [vmem:[#allocation13 + $0x24] sm:$0xf] }
  0xec   :  { %v888_v30 = vadd.f32 %v887_v20, %v875_v29  ;;  %v3529_v20 = vld [vmem:[#allocation11 + $0x44] sm:$0xf]  ;;  %v2862_v29 = vor.u32 %v3527_v26, %v2859_v27  ;;  %v2915_v27 = vld [vmem:[#allocation13 + $0x28] sm:$0xf0] }
  0xed   :  { %v2870_v23 = vor.u32 %v3529_v20, %v2867_v21  ;;  %1252 = vmatpush.bf16.msra.mxu0 %v2858_v28  ;;  %v2918_v28 = vor.u32 %v3541_v25, %v2915_v27  ;;  %v3577_v25 = vld [vmem:[#allocation16 + $0xc0] sm:$0xf0]  ;;  %v3047_v27 = vld [vmem:[#allocation16 + $0xc4] sm:$0xf0] }
  0xee   :  { %3682 = vtanh.f32 %v888_v30  ;;  %v863_v32 = vpop.f32.mrf.mxu0  ;;  %v900_v36 = vpop.f32.mrf.mxu3 }
  0xef   :  { %v901_v48 = vadd.f32 %v900_v36, %v279_v47  ;;  %1264 = vmatpush.bf16.msra.mxu2 %v2870_v23  ;;  %v2849_v32 = vld [vmem:[#allocation11 + $0x20] sm:$0xf] }
  0xf0   :  { %v2850_v36 = vor.u32 %v3526_v33, %v2849_v32  ;;  %v2833_v47 = vld [vmem:[#allocation11] sm:$0xf]  ;;  %v2907_v33 = vld [vmem:[#allocation13 + $0x18] sm:$0xf0] }
  0xf1   :  { %v913_v35 = vpop.f32.mrf.mxu2  ;;  %v876_v37 = vpop.f32.mrf.mxu1  ;;  %v2913_v23 = vld [vmem:[#allocation13 + $0x20] sm:$0xf] }
  0xf2   :  { %v914_v50 = vadd.f32 %v913_v35, %v901_v48  ;;  %v3525_v35 = vld [vmem:[#allocation11 + $0x24] sm:$0xf]  ;;  %v2851_v37 = vld [vmem:[#allocation11 + $0x28] sm:$0xf0]  ;;  %1253 = vmatpush.bf16.msra.mxu0 %v2850_v36  ;;  %v3522_v48 = vld [vmem:[#allocation11 + $0x4] sm:$0xf0]  ;;  %v2914_v26 = vor.u32 %v3542_v24, %v2913_v23  ;;  %v3078_v23 = vor.u32 %v3581_v14, %v3075_v6 }
  0xf3   :  { %1265 = vmatpush.bf16.msra.mxu2 %v2862_v29  ;;  %v2905_v29 = vld [vmem:[#allocation13 + $0x10] sm:$0xf]  ;;  %v2897_v36 = vld [vmem:[#allocation13] sm:$0xf]  ;;  %v3045_v24 = vld [vmem:[#allocation16 + $0xa8] sm:$0xf] }
  0xf4   :  { %v3683_v38 = vpop.eup %3682 }
  0xf5   :  { %v984_v40 = vpack.c.bf16 %v3683_v38, %v3683_v38  ;;  %v2854_v38 = vor.u32 %v3525_v35, %v2851_v37  ;;  %v3538_v37 = vld [vmem:[#allocation13 + $0x4] sm:$0xf0] }
  0xf6   :  { %v902_v44 = vpop.f32.mrf.mxu3 }
  0xf7   :  { %1126 = vmatmul.bf16.vlgmr.msrb.gmra.mxu1 %v984_v40  ;;  %1266 = vmatpush.bf16.msra.mxu2 %v2854_v38  ;;  %v3524_v40 = vld [vmem:[#allocation11 + $0x14] sm:$0xf0]  ;;  %v2843_v44 = vld [vmem:[#allocation11 + $0x18] sm:$0xf0]  ;;  %v3537_v38 = vld [vmem:[#allocation13 + $0x4] sm:$0xf] }
  0xf8   :  { %v2842_v43 = vor.u32 %v3524_v40, %v2841_v39  ;;  %v2898_v39 = vor.u32 %v3538_v37, %v2897_v36  ;;  %v2899_v40 = vld [vmem:[#allocation13 + $0x8] sm:$0xf0] }
  0xf9   :  { %v915_v42 = vpop.f32.mrf.mxu2  ;;  %v3271_v36 = vld [vmem:[#allocation16 + $0x284] sm:$0xf0] }
  0xfa   :  { %v3523_v42 = vld [vmem:[#allocation11 + $0x14] sm:$0xf]  ;;  %1254 = vmatpush.bf16.msra.mxu0 %v2842_v43  ;;  %v3157_v43 = vld [vmem:[#allocation16 + $0x188] sm:$0xf] }
  0xfb   :  { %v2846_v45 = vor.u32 %v3523_v42, %v2843_v44  ;;  %v2902_v42 = vor.u32 %v3537_v38, %v2899_v40  ;;  %v3605_v44 = vld [vmem:[#allocation16 + $0x1a0] sm:$0xf0]  ;;  %v3017_v38 = vld [vmem:[#allocation16 + $0x70] sm:$0xf]  ;;  %v3567_v40 = vld [vmem:[#allocation16 + $0x74] sm:$0xf] }
  0xfd   :  { %1267 = vmatpush.bf16.msra.mxu2 %v2846_v45  ;;  %v3602_v45 = vld [vmem:[#allocation16 + $0x18c] sm:$0xf] }
 0x106   :  { %v926_v49 = vpop.f32.mrf.mxu0 }
 0x107   :  { %v927_v52 = vadd.f32 %v926_v49, %v914_v50  ;;  %v3521_v49 = vld [vmem:[#allocation11 + $0x4] sm:$0xf]  ;;  %v2834_v50 = vor.u32 %v3522_v48, %v2833_v47  ;;  %v3158_v47 = vor.u32 %v3605_v44, %v3157_v43  ;;  %v3159_v48 = vld [vmem:[#allocation16 + $0x1a4] sm:$0xf0] }
 0x109   :  { %v939_v51 = vpop.f32.mrf.mxu1  ;;  %1255 = vmatpush.bf16.msra.mxu0 %v2834_v50  ;;  %v3598_v50 = vld [vmem:[#allocation16 + $0x168] sm:$0xf0] }
 0x10a   :  { %v940_v56 = vadd.f32 %v939_v51, %v927_v52  ;;  %v2835_v51 = vld [vmem:[#allocation11 + $0x8] sm:$0xf0] }
 0x10b   :  { %v2838_v52 = vor.u32 %v3521_v49, %v2835_v51  ;;  %v3129_v49 = vld [vmem:[#allocation16 + $0x150] sm:$0xf]  ;;  %v3162_v51 = vor.u32 %v3602_v45, %v3159_v48 }
 0x10d   :  { %1268 = vmatpush.bf16.msra.mxu2 %v2838_v52  ;;  %v3595_v52 = vld [vmem:[#allocation16 + $0x154] sm:$0xf]  ;;  %2130 = vmatpush.bf16.msrb.mxu0 %v3158_v47  ;;  %v3241_v47 = vld [vmem:[#allocation16 + $0x230] sm:$0xf] }
 0x10e   :  { %v952_v53 = vpop.f32.mrf.mxu3  ;;  %v928_v54 = vpop.f32.mrf.mxu0 }
 0x10f   :  { %v953_v58 = vadd.f32 %v952_v53, %v940_v56  ;;  %v2953_v53 = vld [vmem:[#allocation13 + $0x70] sm:$0xf]  ;;  %v3552_v54 = vld [vmem:[#allocation13 + $0x74] sm:$0xf0]  ;;  %v3551_v56 = vld [vmem:[#allocation13 + $0x74] sm:$0xf] }
 0x111   :  { %v965_v57 = vpop.f32.mrf.mxu2  ;;  %v941_v59 = vpop.f32.mrf.mxu1 }
 0x112   :  { %v966_v61 = vadd.f32 %v965_v57, %v953_v58  ;;  %v2954_v57 = vor.u32 %v3552_v54, %v2953_v53  ;;  %v2955_v58 = vld [vmem:[#allocation13 + $0x78] sm:$0xf0]  ;;  %v2945_v59 = vld [vmem:[#allocation13 + $0x60] sm:$0xf]  ;;  %v3131_v53 = vld [vmem:[#allocation16 + $0x16c] sm:$0xf0] }
 0x113   :  { %v3381_v54 = vld [vmem:[#allocation16 + $0x348] sm:$0xf] }
 0x114   :  { %1380 = vmatpush.bf16.msra.mxu1 %v2954_v57  ;;  %v3661_v57 = vld [vmem:[#allocation16 + $0x360] sm:$0xf0] }
 0x116   :  { %v954_v62 = vpop.f32.mrf.mxu3  ;;  %v978_v63 = vpop.f32.mrf.mxu0 }
 0x117   :  { %v979_v0 = vadd.f32 %v978_v63, %v966_v61  ;;  %v3550_v61 = vld [vmem:[#allocation13 + $0x64] sm:$0xf0]  ;;  %v2958_v62 = vor.u32 %v3551_v56, %v2955_v58  ;;  %v3549_v63 = vld [vmem:[#allocation13 + $0x64] sm:$0xf]  ;;  %v3130_v56 = vor.u32 %v3598_v50, %v3129_v49  ;;  %v3658_v58 = vld [vmem:[#allocation16 + $0x34c] sm:$0xf] }
 0x118   :  { %v3626_v50 = vld [vmem:[#allocation16 + $0x248] sm:$0xf0] }
 0x119   :  { %v967_v1 = vpop.f32.mrf.mxu2  ;;  %3684 = vtanh.f32 %v979_v0  ;;  %v2947_v0 = vld [vmem:[#allocation13 + $0x68] sm:$0xf0]  ;;  %1393 = vmatpush.bf16.msra.mxu3 %v2958_v62  ;;  %v3382_v62 = vor.u32 %v3661_v57, %v3381_v54  ;;  %2131 = vmatpush.bf16.msrb.mxu0 %v3130_v56  ;;  %v2989_v54 = vld [vmem:[#allocation16 + $0x38] sm:$0xf]  ;;  %v3563_v56 = vld [vmem:[#allocation16 + $0x50] sm:$0xf0] }
 0x11a   :  { %v2946_v1 = vor.u32 %v3550_v61, %v2945_v59  ;;  %v3383_v59 = vld [vmem:[#allocation16 + $0x364] sm:$0xf0]  ;;  %v3134_v61 = vor.u32 %v3595_v52, %v3131_v53  ;;  %v3243_v52 = vld [vmem:[#allocation16 + $0x24c] sm:$0xf0] }
 0x11b   :  { %2143 = vmatpush.bf16.msrb.mxu2 %v3382_v62 }
 0x11c   :  { %1381 = vmatpush.bf16.msra.mxu1 %v2946_v1  ;;  %v3591_v1 = vld [vmem:[#allocation16 + $0x130] sm:$0xf0] }
 0x11e   :  { %v980_v2 = vpop.f32.mrf.mxu0 }
 0x11f   :  { %v3685_v3 = vpop.eup %3684  ;;  %v2950_v2 = vor.u32 %v3549_v63, %v2947_v0  ;;  %v3386_v63 = vor.u32 %v3658_v58, %v3383_v59  ;;  %v3101_v0 = vld [vmem:[#allocation16 + $0x118] sm:$0xf]  ;;  %v3560_v58 = vld [vmem:[#allocation16 + $0x3c] sm:$0xf] }
 0x120   :  { %v985_v4 = vpack.c.bf16 %v3685_v3, %v3685_v3  ;;  %v2937_v3 = vld [vmem:[#allocation13 + $0x50] sm:$0xf]  ;;  %v3102_v55 = vor.u32 %v3591_v1, %v3101_v0  ;;  %v2991_v59 = vld [vmem:[#allocation16 + $0x54] sm:$0xf0]  ;;  %v2961_v0 = vld [vmem:[#allocation16] sm:$0xf] }
 0x121   :  { %1394 = vmatpush.bf16.msra.mxu3 %v2950_v2  ;;  %v3588_v2 = vld [vmem:[#allocation16 + $0x11c] sm:$0xf] }
 0x122   :  { %1139 = vmatmul.bf16.vlgmr.msrb.gmra.mxu3 %v985_v4  ;;  %v3548_v4 = vld [vmem:[#allocation13 + $0x54] sm:$0xf0]  ;;  %2132 = vmatpush.bf16.msrb.mxu0 %v3102_v55  ;;  %v3556_v1 = vld [vmem:[#allocation16 + $0x18] sm:$0xf0]  ;;  %v3165_v55 = vld [vmem:[#allocation16 + $0x190] sm:$0xf] }
 0x123   :  { %v2938_v9 = vor.u32 %v3548_v4, %v2937_v3  ;;  %v3103_v3 = vld [vmem:[#allocation16 + $0x134] sm:$0xf0]  ;;  %v3353_v4 = vld [vmem:[#allocation16 + $0x310] sm:$0xf]  ;;  %v2962_v14 = vor.u32 %v3556_v1, %v2961_v0 }
 0x124   :  { %v3354_v8 = vor.u32 %v3654_v7, %v3353_v4  ;;  %v2994_v4 = vor.u32 %v3560_v58, %v2991_v59  ;;  %v2963_v7 = vld [vmem:[#allocation16 + $0x1c] sm:$0xf0]  ;;  %v3582_v58 = vld [vmem:[#allocation16 + $0xec] sm:$0xf]  ;;  %v3083_v59 = vld [vmem:[#allocation16 + $0x104] sm:$0xf0] }
 0x125   :  { %1382 = vmatpush.bf16.msra.mxu1 %v2938_v9  ;;  %1395 = vmatpush.bf16.msra.mxu3 %v2942_v10  ;;  %v3651_v9 = vld [vmem:[#allocation16 + $0x314] sm:$0xf]  ;;  %v3355_v10 = vld [vmem:[#allocation16 + $0x32c] sm:$0xf0]  ;;  %v3086_v1 = vor.u32 %v3582_v58, %v3083_v59 }
 0x126   :  { %v3358_v34 = vor.u32 %v3651_v9, %v3355_v10  ;;  %2144 = vmatpush.bf16.msrb.mxu2 %v3354_v8  ;;  %v3213_v8 = vld [vmem:[#allocation16 + $0x1f8] sm:$0xf]  ;;  %v3619_v9 = vld [vmem:[#allocation16 + $0x210] sm:$0xf0] }
 0x127   :  { %v3214_v6 = vor.u32 %v3619_v9, %v3213_v8  ;;  %v3575_v8 = vld [vmem:[#allocation16 + $0xb4] sm:$0xf]  ;;  %v3055_v9 = vld [vmem:[#allocation16 + $0xcc] sm:$0xf0] }
 0x129   :  { %1383 = vmatpush.bf16.msra.mxu1 %v2930_v12  ;;  %1396 = vmatpush.bf16.msra.mxu3 %v2934_v41  ;;  %v3106_v12 = vor.u32 %v3588_v2, %v3103_v3  ;;  %v3325_v41 = vld [vmem:[#allocation16 + $0x2d8] sm:$0xf]  ;;  %v3553_v2 = vld [vmem:[#allocation16 + $0x4] sm:$0xf] }
 0x12d   :  { %1384 = vmatpush.bf16.msra.mxu1 %v2922_v60  ;;  %1397 = vmatpush.bf16.msra.mxu3 %v2926_v16  ;;  %v4113_v60 = vld [vmem:[%s4160_s6] sm:$0x3]  ;;  %v3326_v16 = vor.u32 %v3647_v13, %v3325_v41  ;;  %v3616_v41 = vld [vmem:[#allocation16 + $0x1fc] sm:$0xf]  ;;  %v3215_v13 = vld [vmem:[#allocation16 + $0x214] sm:$0xf0] }
 0x12e   :  { %v1165_v57 = vperm.slane %v4113_v60, 1 }
 0x12f   :  { %2145 = vmatpush.bf16.msrb.mxu2 %v3326_v16  ;;  %v2966_v16 = vor.u32 %v3553_v2, %v2963_v7  ;;  %v3053_v2 = vld [vmem:[#allocation16 + $0xb0] sm:$0xf] }
 0x131   :  { %1385 = vmatpush.bf16.msra.mxu1 %v2914_v26  ;;  %1398 = vmatpush.bf16.msra.mxu3 %v2918_v28  ;;  %v3574_v26 = vld [vmem:[#allocation16 + $0xac] sm:$0xf]  ;;  %v1164_v28 = vperm.slane %v4113_v60, 0 }
 0x132   :  { %v3050_v37 = vor.u32 %v3574_v26, %v3047_v27  ;;  %v3139_v26 = vld [vmem:[#allocation16 + $0x174] sm:$0xf0]  ;;  %v3609_v27 = vld [vmem:[#allocation16 + $0x1c4] sm:$0xf] }
 0x174   :  { %v4107_v30 = vpop.f32.mrf.mxu1 }
 0x175   :  { %v1128_v17 = vadd.f32 %v3681_v15, %v4107_v30  ;;  %v3540_v30 = vld [vmem:[#allocation13 + $0x14] sm:$0xf0] }
 0x176   :  { %v2906_v32 = vor.u32 %v3540_v30, %v2905_v29  ;;  %v3327_v15 = vld [vmem:[#allocation16 + $0x2f4] sm:$0xf0] }
 0x178   :  { %1386 = vmatpush.bf16.msra.mxu1 %v2906_v32  ;;  %v3046_v32 = vor.u32 %v3577_v25, %v3045_v24  ;;  %v3389_v24 = vld [vmem:[#allocation16 + $0x350] sm:$0xf]  ;;  %v3662_v25 = vld [vmem:[#allocation16 + $0x368] sm:$0xf0] }
 0x17c   :  { %v1129_v31 = vpop.f32.mrf.mxu1  ;;  %1387 = vmatpush.bf16.msra.mxu1 %v2898_v39  ;;  %v3570_v39 = vld [vmem:[#allocation16 + $0x88] sm:$0xf0] }
 0x17d   :  { %v3539_v31 = vld [vmem:[#allocation13 + $0x14] sm:$0xf]  ;;  %v3018_v49 = vor.u32 %v3570_v39, %v3017_v38  ;;  %v3592_v39 = vld [vmem:[#allocation16 + $0x138] sm:$0xf0] }
 0x17e   :  { %v2910_v35 = vor.u32 %v3539_v31, %v2907_v33  ;;  %v3269_v31 = vld [vmem:[#allocation16 + $0x268] sm:$0xf]  ;;  %v3633_v33 = vld [vmem:[#allocation16 + $0x280] sm:$0xf0] }
 0x17f   :  { %v3270_v44 = vor.u32 %v3633_v33, %v3269_v31  ;;  %v3391_v31 = vld [vmem:[#allocation16 + $0x36c] sm:$0xf0] }
 0x180   :  { %1399 = vmatpush.bf16.msra.mxu3 %v2910_v35  ;;  %2156 = vmatpush.bf16.msrb.mxu1 %v3162_v51  ;;  %v3630_v35 = vld [vmem:[#allocation16 + $0x26c] sm:$0xf]  ;;  %v3623_v51 = vld [vmem:[#allocation16 + $0x234] sm:$0xf] }
 0x181   :  { %v3274_v45 = vor.u32 %v3630_v35, %v3271_v36  ;;  %v3246_v62 = vor.u32 %v3623_v51, %v3243_v52  ;;  %v3390_v35 = vor.u32 %v3662_v25, %v3389_v24  ;;  %v3109_v36 = vld [vmem:[#allocation16 + $0x120] sm:$0xf]  ;;  %v3081_v51 = vld [vmem:[#allocation16 + $0xe8] sm:$0xf]  ;;  %v3561_v25 = vld [vmem:[#allocation16 + $0x44] sm:$0xf] }
 0x184   :  { %1400 = vmatpush.bf16.msra.mxu3 %v2902_v42  ;;  %2157 = vmatpush.bf16.msrb.mxu1 %v3134_v61  ;;  %v3019_v42 = vld [vmem:[#allocation16 + $0x8c] sm:$0xf0]  ;;  %v3242_v61 = vor.u32 %v3626_v50, %v3241_v47  ;;  %v3652_v47 = vld [vmem:[#allocation16 + $0x31c] sm:$0xf] }
 0x185   :  { %v3022_v53 = vor.u32 %v3567_v40, %v3019_v42  ;;  %v3361_v40 = vld [vmem:[#allocation16 + $0x318] sm:$0xf]  ;;  %v3655_v42 = vld [vmem:[#allocation16 + $0x330] sm:$0xf0] }
 0x186   :  { %v3362_v50 = vor.u32 %v3655_v42, %v3361_v40  ;;  %v3221_v42 = vld [vmem:[#allocation16 + $0x200] sm:$0xf] }
 0x188   :  { %2169 = vmatpush.bf16.msrb.mxu3 %v3386_v63  ;;  %2158 = vmatpush.bf16.msrb.mxu1 %v3106_v12  ;;  %v2990_v63 = vor.u32 %v3563_v56, %v2989_v54  ;;  %v3167_v12 = vld [vmem:[#allocation16 + $0x1ac] sm:$0xf0]  ;;  %v3333_v54 = vld [vmem:[#allocation16 + $0x2e0] sm:$0xf]  ;;  %v3648_v56 = vld [vmem:[#allocation16 + $0x2f8] sm:$0xf0] }
 0x189   :  { %v3334_v0 = vor.u32 %v3648_v56, %v3333_v54  ;;  %v1294_v56 = vld [vmem:[#allocation14] sm:$0x3] }
 0x18c   :  { %2170 = vmatpush.bf16.msrb.mxu3 %v3358_v34  ;;  %2159 = vmatpush.bf16.msrb.mxu1 %v3078_v23  ;;  %v3606_v34 = vld [vmem:[#allocation16 + $0x1a8] sm:$0xf0]  ;;  %v3596_v23 = vld [vmem:[#allocation16 + $0x15c] sm:$0xf] }
 0x190   :  { %2160 = vmatpush.bf16.msrb.mxu1 %v3050_v37  ;;  %v3142_v37 = vor.u32 %v3596_v23, %v3139_v26  ;;  %v3564_v23 = vld [vmem:[#allocation16 + $0x58] sm:$0xf0]  ;;  %v2999_v26 = vld [vmem:[#allocation16 + $0x5c] sm:$0xf0] }
 0x194   :  { %2161 = vmatpush.bf16.msrb.mxu1 %v3022_v53  ;;  %v3585_v53 = vld [vmem:[#allocation16 + $0x100] sm:$0xf0] }
 0x198   :  { %2162 = vmatpush.bf16.msrb.mxu1 %v2994_v4 }
 0x19c   :  { %2163 = vmatpush.bf16.msrb.mxu1 %v2966_v16  ;;  %v3277_v16 = vld [vmem:[#allocation16 + $0x270] sm:$0xf] }
 0x1a5   :  { %v1140_v18 = vpop.f32.mrf.mxu3 }
 0x1a6   :  { %v1141_v19 = vadd.f32 %v1140_v18, %v1128_v17  ;;  %v3330_v17 = vor.u32 %v3644_v46, %v3327_v15  ;;  %v3297_v18 = vld [vmem:[#allocation16 + $0x2a0] sm:$0xf]  ;;  %v3137_v15 = vld [vmem:[#allocation16 + $0x158] sm:$0xf] }
 0x1a8   :  { %3686 = vtanh.f32 %v1141_v19  ;;  %v3074_v19 = vor.u32 %v3584_v5, %v3073_v11  ;;  %2171 = vmatpush.bf16.msrb.mxu3 %v3330_v17  ;;  %v3603_v11 = vld [vmem:[#allocation16 + $0x194] sm:$0xf]  ;;  %v3166_v17 = vor.u32 %v3606_v34, %v3165_v55  ;;  %v3305_v55 = vld [vmem:[#allocation16 + $0x2a8] sm:$0xf]  ;;  %v3641_v34 = vld [vmem:[#allocation16 + $0x2c0] sm:$0xf0] }
 0x1aa   :  { %2133 = vmatpush.bf16.msrb.mxu0 %v3074_v19  ;;  %v3185_v19 = vld [vmem:[#allocation16 + $0x1c0] sm:$0xf] }
 0x1ad   :  { %v1142_v20 = vpop.f32.mrf.mxu3 }
 0x1ae   :  { %v3687_v21 = vpop.eup %3686  ;;  %v3640_v20 = vld [vmem:[#allocation16 + $0x2b8] sm:$0xf0]  ;;  %2134 = vmatpush.bf16.msrb.mxu0 %v3046_v32 }
 0x1af   :  { %v1145_v22 = vpack.c.bf16 %v3687_v21, %v3687_v21  ;;  %v3637_v21 = vld [vmem:[#allocation16 + $0x2a4] sm:$0xf]  ;;  %v3298_v29 = vor.u32 %v3640_v20, %v3297_v18  ;;  %v3599_v18 = vld [vmem:[#allocation16 + $0x170] sm:$0xf0]  ;;  %v3612_v20 = vld [vmem:[#allocation16 + $0x1d8] sm:$0xf0] }
 0x1b0   :  { %v3138_v33 = vor.u32 %v3599_v18, %v3137_v15  ;;  %v3027_v15 = vld [vmem:[#allocation16 + $0x94] sm:$0xf0] }
 0x1b1   :  { %1256 = vmatmul.bf16.vlgmr.msra.gmra.mxu0 %v1145_v22  ;;  %1269 = vmatmul.bf16.vlgmr.msra.gmra.mxu2 %v1145_v22  ;;  %v3299_v22 = vld [vmem:[#allocation16 + $0x2bc] sm:$0xf0] }
 0x1b2   :  { %v3302_v30 = vor.u32 %v3637_v21, %v3299_v22  ;;  %2146 = vmatpush.bf16.msrb.mxu2 %v3298_v29  ;;  %2135 = vmatpush.bf16.msrb.mxu0 %v3018_v49  ;;  %v3170_v21 = vor.u32 %v3603_v11, %v3167_v12  ;;  %v3218_v22 = vor.u32 %v3616_v41, %v3215_v13  ;;  %v3307_v12 = vld [vmem:[#allocation16 + $0x2c4] sm:$0xf0]  ;;  %v3025_v13 = vld [vmem:[#allocation16 + $0x78] sm:$0xf] }
 0x1b3   :  { %v3186_v29 = vor.u32 %v3612_v20, %v3185_v19  ;;  %v3110_v49 = vor.u32 %v3592_v39, %v3109_v36  ;;  %v3306_v11 = vor.u32 %v3641_v34, %v3305_v55  ;;  %v3631_v19 = vld [vmem:[#allocation16 + $0x274] sm:$0xf]  ;;  %v3279_v20 = vld [vmem:[#allocation16 + $0x28c] sm:$0xf0]  ;;  %v3557_v36 = vld [vmem:[#allocation16 + $0x20] sm:$0xf0] }
 0x1b4   :  { %2172 = vmatpush.bf16.msrb.mxu3 %v3302_v30  ;;  %v3659_v30 = vld [vmem:[#allocation16 + $0x354] sm:$0xf]  ;;  %v2971_v39 = vld [vmem:[#allocation16 + $0x24] sm:$0xf0]  ;;  %v3600_v34 = vld [vmem:[#allocation16 + $0x178] sm:$0xf0] }
 0x1b6   :  { %2147 = vmatpush.bf16.msrb.mxu2 %v3270_v44  ;;  %2136 = vmatpush.bf16.msrb.mxu0 %v2990_v63  ;;  %v3589_v44 = vld [vmem:[#allocation16 + $0x124] sm:$0xf]  ;;  %v3082_v63 = vor.u32 %v3585_v53, %v3081_v51  ;;  %v3195_v53 = vld [vmem:[#allocation16 + $0x1e4] sm:$0xf0] }
 0x1b8   :  { %2173 = vmatpush.bf16.msrb.mxu3 %v3274_v45  ;;  %v3111_v45 = vld [vmem:[#allocation16 + $0x13c] sm:$0xf0] }
 0x1b9   :  { %v3114_v52 = vor.u32 %v3589_v44, %v3111_v45  ;;  %v3617_v45 = vld [vmem:[#allocation16 + $0x204] sm:$0xf] }
 0x1ba   :  { %2148 = vmatpush.bf16.msrb.mxu2 %v3242_v61  ;;  %2137 = vmatpush.bf16.msrb.mxu0 %v2962_v14  ;;  %v3645_v61 = vld [vmem:[#allocation16 + $0x2e4] sm:$0xf] }
 0x1bc   :  { %2174 = vmatpush.bf16.msrb.mxu3 %v3246_v62  ;;  %v3335_v62 = vld [vmem:[#allocation16 + $0x2fc] sm:$0xf0] }
 0x1bd   :  { %v3338_v4 = vor.u32 %v3645_v61, %v3335_v62  ;;  %v1297_v61 = vperm.slane %v1294_v56, 1  ;;  %v3173_v62 = vld [vmem:[#allocation16 + $0x198] sm:$0xf] }
 0x1be   :  { %2149 = vmatpush.bf16.msrb.mxu2 %v3214_v6  ;;  %2182 = vmatpush.bf16.msra.mxu0 %v3166_v17  ;;  %v3568_v6 = vld [vmem:[#allocation16 + $0x7c] sm:$0xf]  ;;  %v3634_v17 = vld [vmem:[#allocation16 + $0x288] sm:$0xf0] }
 0x1bf   :  { %v3278_v18 = vor.u32 %v3634_v17, %v3277_v16  ;;  %v3593_v16 = vld [vmem:[#allocation16 + $0x140] sm:$0xf0]  ;;  %v3590_v17 = vld [vmem:[#allocation16 + $0x12c] sm:$0xf] }
 0x1c0   :  { %2175 = vmatpush.bf16.msrb.mxu3 %v3218_v22  ;;  %v2997_v22 = vld [vmem:[#allocation16 + $0x40] sm:$0xf] }
 0x1c1   :  { %v2998_v24 = vor.u32 %v3564_v23, %v2997_v22  ;;  %v3369_v22 = vld [vmem:[#allocation16 + $0x320] sm:$0xf] }
 0x1c2   :  { %2150 = vmatpush.bf16.msrb.mxu2 %v3186_v29  ;;  %2183 = vmatpush.bf16.msra.mxu0 %v3138_v33  ;;  %v3627_v29 = vld [vmem:[#allocation16 + $0x250] sm:$0xf0] }
 0x1c6   :  { %2195 = vmatpush.bf16.msra.mxu2 %v3390_v35  ;;  %2184 = vmatpush.bf16.msra.mxu0 %v3110_v49  ;;  %v2969_v35 = vld [vmem:[#allocation16 + $0x8] sm:$0xf] }
 0x1c7   :  { %v3193_v49 = vld [vmem:[#allocation16 + $0x1c8] sm:$0xf] }
 0x1ca   :  { %2196 = vmatpush.bf16.msra.mxu2 %v3362_v50  ;;  %2185 = vmatpush.bf16.msra.mxu0 %v3082_v63  ;;  %v3613_v50 = vld [vmem:[#allocation16 + $0x1e0] sm:$0xf0] }
 0x1cb   :  { %v3194_v51 = vor.u32 %v3613_v50, %v3193_v49  ;;  %v3313_v50 = vld [vmem:[#allocation16 + $0x2b0] sm:$0xf] }
 0x1ce   :  { %2197 = vmatpush.bf16.msra.mxu2 %v3334_v0  ;;  %v3607_v0 = vld [vmem:[#allocation16 + $0x1b0] sm:$0xf0] }
 0x1d2   :  { %2198 = vmatpush.bf16.msra.mxu2 %v3306_v11  ;;  %v3597_v11 = vld [vmem:[#allocation16 + $0x164] sm:$0xf] }
 0x1d6   :  { %2199 = vmatpush.bf16.msra.mxu2 %v3278_v18  ;;  %v3119_v18 = vld [vmem:[#allocation16 + $0x144] sm:$0xf0] }
 0x22e   :  { %v1257_v43 = vpop.f32.mrf.mxu0 }
 0x22f   :  { %v1258_v48 = vadd.f32 %v1257_v43, %v1164_v28  ;;  %v3187_v28 = vld [vmem:[#allocation16 + $0x1dc] sm:$0xf0]  ;;  %v3394_v43 = vor.u32 %v3659_v30, %v3391_v31  ;;  %v3624_v31 = vld [vmem:[#allocation16 + $0x23c] sm:$0xf] }
 0x230   :  { %v3190_v38 = vor.u32 %v3609_v27, %v3187_v28  ;;  %v3002_v27 = vor.u32 %v3561_v25, %v2999_v26  ;;  %v3249_v28 = vld [vmem:[#allocation16 + $0x238] sm:$0xf]  ;;  %v3653_v25 = vld [vmem:[#allocation16 + $0x324] sm:$0xf]  ;;  %v3371_v26 = vld [vmem:[#allocation16 + $0x33c] sm:$0xf0] }
 0x231   :  { %3688 = vtanh.f32 %v1258_v48  ;;  %v3363_v48 = vld [vmem:[#allocation16 + $0x334] sm:$0xf0]  ;;  %v3250_v30 = vor.u32 %v3627_v29, %v3249_v28  ;;  %v3122_v28 = vor.u32 %v3590_v17, %v3119_v18  ;;  %v3089_v29 = vld [vmem:[#allocation16 + $0xf0] sm:$0xf] }
 0x232   :  { %2176 = vmatpush.bf16.msrb.mxu3 %v3190_v38  ;;  %v3554_v38 = vld [vmem:[#allocation16 + $0xc] sm:$0xf]  ;;  %v2979_v17 = vld [vmem:[#allocation16 + $0x2c] sm:$0xf0] }
 0x233   :  { %2200 = vmatpush.bf16.msra.mxu2 %v3250_v30  ;;  %v2974_v40 = vor.u32 %v3554_v38, %v2971_v39  ;;  %v3586_v30 = vld [vmem:[#allocation16 + $0x108] sm:$0xf0]  ;;  %v3343_v39 = vld [vmem:[#allocation16 + $0x304] sm:$0xf0] }
 0x234   :  { %v1270_v3 = vpop.f32.mrf.mxu2  ;;  %v3646_v38 = vld [vmem:[#allocation16 + $0x2ec] sm:$0xf] }
 0x235   :  { %v1271_v10 = vadd.f32 %v1270_v3, %v1165_v57  ;;  %v3366_v57 = vor.u32 %v3652_v47, %v3363_v48  ;;  %v3578_v3 = vld [vmem:[#allocation16 + $0xc8] sm:$0xf0]  ;;  %v3223_v47 = vld [vmem:[#allocation16 + $0x21c] sm:$0xf0]  ;;  %v3346_v49 = vor.u32 %v3646_v38, %v3343_v39  ;;  %v3203_v38 = vld [vmem:[#allocation16 + $0x1ec] sm:$0xf0] }
 0x236   :  { %v1259_v5 = vpop.f32.mrf.mxu0  ;;  %v3054_v7 = vor.u32 %v3578_v3, %v3053_v2  ;;  %v3226_v48 = vor.u32 %v3617_v45, %v3223_v47  ;;  %v3175_v2 = vld [vmem:[#allocation16 + $0x1b4] sm:$0xf0]  ;;  %v3576_v45 = vld [vmem:[#allocation16 + $0xbc] sm:$0xf]  ;;  %v3405_v39 = vld [vmem:[#allocation16 + $0x360] sm:$0xf] }
 0x237   :  { %v3689_v46 = vpop.eup %3688  ;;  %1275 = vst.msk [vmem:[%s4165_s11] sm:$0xff] %vm1274_vm1, %v1271_v10  ;;  %v3058_v10 = vor.u32 %v3575_v8, %v3055_v9  ;;  %v3638_v5 = vld [vmem:[#allocation16 + $0x2ac] sm:$0xf]  ;;  %v3174_v8 = vor.u32 %v3607_v0, %v3173_v62  ;;  %v3063_v47 = vld [vmem:[#allocation16 + $0xd4] sm:$0xf0] }
 0x238   :  { %v1277_v60 = vpack.c.bf16 %v3689_v46, %v3689_v46  ;;  %2186 = vmatpush.bf16.msra.mxu0 %v3054_v7  ;;  %v3310_v41 = vor.u32 %v3638_v5, %v3307_v12  ;;  %v3571_v46 = vld [vmem:[#allocation16 + $0x90] sm:$0xf0]  ;;  %v3147_v5 = vld [vmem:[#allocation16 + $0x17c] sm:$0xf0]  ;;  %v3397_v12 = vld [vmem:[#allocation16 + $0x358] sm:$0xf] }
 0x239   :  { %v3026_v14 = vor.u32 %v3571_v46, %v3025_v13  ;;  %v3660_v13 = vld [vmem:[#allocation16 + $0x35c] sm:$0xf]  ;;  %v3399_v46 = vld [vmem:[#allocation16 + $0x374] sm:$0xf0] }
 0x23a   :  { %1388 = vmatmul.bf16.vlgmr.msra.gmra.mxu1 %v1277_v60  ;;  %1401 = vmatmul.bf16.vlgmr.msra.gmra.mxu3 %v1277_v60  ;;  %v3030_v60 = vor.u32 %v3568_v6, %v3027_v15  ;;  %v3150_v6 = vor.u32 %v3597_v11, %v3147_v5  ;;  %v3117_v15 = vld [vmem:[#allocation16 + $0x128] sm:$0xf]  ;;  %v3285_v0 = vld [vmem:[#allocation16 + $0x278] sm:$0xf] }
 0x23b   :  { %2208 = vmatpush.bf16.msra.mxu1 %v3170_v21  ;;  %2221 = vmatpush.bf16.msra.mxu3 %v3394_v43  ;;  %v3282_v21 = vor.u32 %v3631_v19, %v3279_v20  ;;  %v3620_v43 = vld [vmem:[#allocation16 + $0x218] sm:$0xf0] }
 0x23c   :  { %v1272_v32 = vpop.f32.mrf.mxu2  ;;  %2187 = vmatpush.bf16.msra.mxu0 %v3026_v14  ;;  %v3222_v44 = vor.u32 %v3620_v43, %v3221_v42  ;;  %v3061_v43 = vld [vmem:[#allocation16 + $0xb8] sm:$0xf] }
 0x23d   :  { %v3251_v32 = vld [vmem:[#allocation16 + $0x254] sm:$0xf0] }
 0x23e   :  { %v3254_v33 = vor.u32 %v3624_v31, %v3251_v32  ;;  %2201 = vmatpush.bf16.msra.mxu2 %v3222_v44  ;;  %v3583_v31 = vld [vmem:[#allocation16 + $0xf4] sm:$0xf]  ;;  %v3091_v32 = vld [vmem:[#allocation16 + $0x10c] sm:$0xf0] }
 0x23f   :  { %2209 = vmatpush.bf16.msra.mxu1 %v3142_v37  ;;  %2222 = vmatpush.bf16.msra.mxu3 %v3366_v57  ;;  %v2970_v37 = vor.u32 %v3557_v36, %v2969_v35  ;;  %v1296_v57 = vperm.slane %v1294_v56, 0  ;;  %v3374_v35 = vor.u32 %v3653_v25, %v3371_v26  ;;  %v3341_v36 = vld [vmem:[#allocation16 + $0x2e8] sm:$0xf]  ;;  %v3094_v42 = vor.u32 %v3583_v31, %v3091_v32  ;;  %v3579_v44 = vld [vmem:[#allocation16 + $0xd0] sm:$0xf0] }
 0x240   :  { %2188 = vmatpush.bf16.msra.mxu0 %v2998_v24  ;;  %v3656_v24 = vld [vmem:[#allocation16 + $0x338] sm:$0xf0]  ;;  %v3066_v56 = vor.u32 %v3576_v45, %v3063_v47  ;;  %v3618_v25 = vld [vmem:[#allocation16 + $0x20c] sm:$0xf]  ;;  %v3231_v26 = vld [vmem:[#allocation16 + $0x224] sm:$0xf0] }
 0x241   :  { %v3234_v31 = vor.u32 %v3618_v25, %v3231_v26  ;;  %v3153_v32 = vld [vmem:[#allocation16 + $0x168] sm:$0xf]  ;;  %v3125_v45 = vld [vmem:[#allocation16 + $0x130] sm:$0xf]  ;;  %v3594_v47 = vld [vmem:[#allocation16 + $0x148] sm:$0xf0] }
 0x242   :  { %2202 = vmatpush.bf16.msra.mxu2 %v3194_v51  ;;  %v3642_v51 = vld [vmem:[#allocation16 + $0x2c8] sm:$0xf0] }
 0x243   :  { %2210 = vmatpush.bf16.msra.mxu1 %v3114_v52  ;;  %2223 = vmatpush.bf16.msra.mxu3 %v3338_v4  ;;  %v3610_v52 = vld [vmem:[#allocation16 + $0x1cc] sm:$0xf]  ;;  %v3314_v62 = vor.u32 %v3642_v51, %v3313_v50  ;;  %v3657_v50 = vld [vmem:[#allocation16 + $0x340] sm:$0xf0]  ;;  %v3126_v51 = vor.u32 %v3594_v47, %v3125_v45 }
 0x244   :  { %2189 = vmatpush.bf16.msra.mxu0 %v2970_v37  ;;  %v3198_v54 = vor.u32 %v3610_v52, %v3195_v53  ;;  %v3649_v37 = vld [vmem:[#allocation16 + $0x300] sm:$0xf0]  ;;  %v3639_v52 = vld [vmem:[#allocation16 + $0x2b4] sm:$0xf]  ;;  %v3315_v53 = vld [vmem:[#allocation16 + $0x2cc] sm:$0xf0] }
 0x247   :  { %2211 = vmatpush.bf16.msra.mxu1 %v3086_v1  ;;  %2224 = vmatpush.bf16.msra.mxu3 %v3310_v41  ;;  %v3604_v1 = vld [vmem:[#allocation16 + $0x19c] sm:$0xf]  ;;  %v3663_v41 = vld [vmem:[#allocation16 + $0x370] sm:$0xf0] }
 0x248   :  { %v3178_v9 = vor.u32 %v3604_v1, %v3175_v2  ;;  %v3398_v20 = vor.u32 %v3663_v41, %v3397_v12  ;;  %v3635_v1 = vld [vmem:[#allocation16 + $0x290] sm:$0xf0]  ;;  %v3632_v2 = vld [vmem:[#allocation16 + $0x27c] sm:$0xf]  ;;  %v3257_v12 = vld [vmem:[#allocation16 + $0x240] sm:$0xf] }
 0x249   :  { %v3286_v11 = vor.u32 %v3635_v1, %v3285_v0  ;;  %v3628_v41 = vld [vmem:[#allocation16 + $0x258] sm:$0xf0]  ;;  %v3643_v0 = vld [vmem:[#allocation16 + $0x2d0] sm:$0xf0] }
 0x24a   :  { %v3258_v18 = vor.u32 %v3628_v41, %v3257_v12  ;;  %v3629_v12 = vld [vmem:[#allocation16 + $0x260] sm:$0xf0] }
 0x24b   :  { %2212 = vmatpush.bf16.msra.mxu1 %v3058_v10  ;;  %2225 = vmatpush.bf16.msra.mxu3 %v3282_v21  ;;  %v3145_v10 = vld [vmem:[#allocation16 + $0x160] sm:$0xf]  ;;  %v3402_v21 = vor.u32 %v3660_v13, %v3399_v46  ;;  %v3625_v13 = vld [vmem:[#allocation16 + $0x244] sm:$0xf] }
 0x24c   :  { %v3146_v14 = vor.u32 %v3600_v34, %v3145_v10  ;;  %v3562_v10 = vld [vmem:[#allocation16 + $0x4c] sm:$0xf]  ;;  %v3007_v34 = vld [vmem:[#allocation16 + $0x64] sm:$0xf0]  ;;  %v3259_v46 = vld [vmem:[#allocation16 + $0x25c] sm:$0xf0] }
 0x24f   :  { %2213 = vmatpush.bf16.msra.mxu1 %v3030_v60  ;;  %2226 = vmatpush.bf16.msra.mxu3 %v3254_v33  ;;  %v3370_v33 = vor.u32 %v3656_v24, %v3369_v22  ;;  %v3229_v22 = vld [vmem:[#allocation16 + $0x208] sm:$0xf]  ;;  %v3621_v24 = vld [vmem:[#allocation16 + $0x220] sm:$0xf0] }
 0x253   :  { %2214 = vmatpush.bf16.msra.mxu1 %v3002_v27  ;;  %2227 = vmatpush.bf16.msra.mxu3 %v3226_v48  ;;  %v3118_v27 = vor.u32 %v3593_v16, %v3117_v15  ;;  %v3342_v48 = vor.u32 %v3649_v37, %v3341_v36  ;;  %v2977_v15 = vld [vmem:[#allocation16 + $0x10] sm:$0xf]  ;;  %v3555_v16 = vld [vmem:[#allocation16 + $0x14] sm:$0xf]  ;;  %v3614_v36 = vld [vmem:[#allocation16 + $0x1e8] sm:$0xf0] }
 0x254   :  { %v3611_v37 = vld [vmem:[#allocation16 + $0x1d4] sm:$0xf] }
 0x257   :  { %2215 = vmatpush.bf16.msra.mxu1 %v2974_v40  ;;  %2228 = vmatpush.bf16.msra.mxu3 %v3198_v54  ;;  %v3090_v40 = vor.u32 %v3586_v30, %v3089_v29  ;;  %v3062_v54 = vor.u32 %v3579_v44, %v3061_v43  ;;  %v3230_v30 = vor.u32 %v3621_v24, %v3229_v22  ;;  %v4142_v22 = vld [vmem:[%s4164_s10] sm:$0xff]  ;;  %s3975_s10 = smov [#allocation17]  }
 0x258   :  { %v3206_v44 = vor.u32 %v3611_v37, %v3203_v38  ;;  %v1540_v24 = vperm.slane %v4142_v22, 0  ;;  %v1541_v25 = vperm.slane %v4142_v22, 1  ;;  %s2355_s28 = sshll.u32 %s3975_s10, 4  ;;  %s2356_s28 = int_to_ptr.vmem [resolvable:$true] %s2355_s28 }
 0x2b7   :  { %v1389_v58 = vpop.f32.mrf.mxu1 }
 0x2b8   :  { %v1390_v59 = vadd.f32 %v1389_v58, %v1296_v57  ;;  %v3033_v57 = vld [vmem:[#allocation16 + $0x80] sm:$0xf]  ;;  %v3572_v58 = vld [vmem:[#allocation16 + $0x98] sm:$0xf0] }
 0x2ba   :  { %3690 = vtanh.f32 %v1390_v59  ;;  %v3569_v59 = vld [vmem:[#allocation16 + $0x84] sm:$0xf] }
 0x2bd   :  { %v1402_v63 = vpop.f32.mrf.mxu3 }
 0x2be   :  { %v1403_v3 = vadd.f32 %v1402_v63, %v1297_v61  ;;  %v3035_v61 = vld [vmem:[#allocation16 + $0x9c] sm:$0xf0]  ;;  %v3318_v63 = vor.u32 %v3639_v52, %v3315_v53  ;;  %v3097_v52 = vld [vmem:[#allocation16 + $0xf8] sm:$0xf]  ;;  %v3587_v53 = vld [vmem:[#allocation16 + $0x110] sm:$0xf0] }
 0x2bf   :  { %v1391_v4 = vpop.f32.mrf.mxu1 }
 0x2c0   :  { %v3691_v7 = vpop.eup %3690  ;;  %3692 = vtanh.f32 %v1403_v3  ;;  %v3287_v3 = vld [vmem:[#allocation16 + $0x294] sm:$0xf0]  ;;  %v3034_v4 = vor.u32 %v3572_v58, %v3033_v57  ;;  %v3650_v57 = vld [vmem:[#allocation16 + $0x308] sm:$0xf0]  ;;  %v3098_v58 = vor.u32 %v3587_v53, %v3097_v52 }
 0x2c1   :  { %v4121_v55 = vpack.c.bf16 %v3691_v7, %v3691_v7  ;;  %v3038_v7 = vor.u32 %v3569_v59, %v3035_v61  ;;  %v3290_v5 = vor.u32 %v3632_v2, %v3287_v3  ;;  %v3069_v59 = vld [vmem:[#allocation16 + $0xc0] sm:$0xf]  ;;  %v3580_v61 = vld [vmem:[#allocation16 + $0xd8] sm:$0xf0]  ;;  %v3041_v2 = vld [vmem:[#allocation16 + $0x88] sm:$0xf] }
 0x2c2   :  { %v3070_v1 = vor.u32 %v3580_v61, %v3069_v59  ;;  %v3573_v3 = vld [vmem:[#allocation16 + $0xa0] sm:$0xf0] }
 0x2c3   :  { %2138 = vmatmul.bf16.vlgmr.msrb.gmra.mxu0 %v4121_v55  ;;  %2164 = vmatmul.bf16.vlgmr.msrb.gmra.mxu1 %v4121_v55 }
 0x2c4   :  { %2234 = vmatpush.bf16.msrb.mxu0 %v3174_v8  ;;  %2260 = vmatpush.bf16.msrb.mxu1 %v3178_v9  ;;  %v3005_v8 = vld [vmem:[#allocation16 + $0x48] sm:$0xf]  ;;  %v3565_v9 = vld [vmem:[#allocation16 + $0x60] sm:$0xf0] }
 0x2c5   :  { %v1404_v60 = vpop.f32.mrf.mxu3 }
 0x2c6   :  { %v3693_v19 = vpop.eup %3692  ;;  %v3558_v60 = vld [vmem:[#allocation16 + $0x28] sm:$0xf0] }
 0x2c7   :  { %v4125_v23 = vpack.c.bf16 %v3693_v19, %v3693_v19  ;;  %v3262_v19 = vor.u32 %v3625_v13, %v3259_v46  ;;  %v2985_v13 = vld [vmem:[#allocation16 + $0x18] sm:$0xf]  ;;  %v3559_v46 = vld [vmem:[#allocation16 + $0x30] sm:$0xf0] }
 0x2c8   :  { %2235 = vmatpush.bf16.msrb.mxu0 %v3146_v14  ;;  %2261 = vmatpush.bf16.msrb.mxu1 %v3150_v6  ;;  %v3006_v14 = vor.u32 %v3565_v9, %v3005_v8  ;;  %v3010_v6 = vor.u32 %v3562_v10, %v3007_v34  ;;  %v3636_v8 = vld [vmem:[#allocation16 + $0x298] sm:$0xf0]  ;;  %v3042_v9 = vor.u32 %v3573_v3, %v3041_v2  ;;  %v3013_v10 = vld [vmem:[#allocation16 + $0x50] sm:$0xf]  ;;  %v3566_v34 = vld [vmem:[#allocation16 + $0x68] sm:$0xf0] }
 0x2c9   :  { %2151 = vmatmul.bf16.vlgmr.msrb.gmra.mxu2 %v4125_v23  ;;  %2177 = vmatmul.bf16.vlgmr.msrb.gmra.mxu3 %v4125_v23  ;;  %v3014_v41 = vor.u32 %v3566_v34, %v3013_v10  ;;  %v1544_v3 = vperm.slane %v4142_v22, 4 }
 0x2ca   :  { %2247 = vmatpush.bf16.msrb.mxu2 %v3398_v20  ;;  %2273 = vmatpush.bf16.msrb.mxu3 %v3402_v21  ;;  %v3181_v20 = vld [vmem:[#allocation16 + $0x1a0] sm:$0xf]  ;;  %v3608_v21 = vld [vmem:[#allocation16 + $0x1b8] sm:$0xf0] }
 0x2cb   :  { %v3182_v29 = vor.u32 %v3608_v21, %v3181_v20 }
 0x2cc   :  { %2236 = vmatpush.bf16.msrb.mxu0 %v3118_v27  ;;  %2262 = vmatpush.bf16.msrb.mxu1 %v3122_v28  ;;  %v2978_v27 = vor.u32 %v3558_v60, %v2977_v15  ;;  %v2982_v28 = vor.u32 %v3555_v16, %v2979_v17  ;;  %v3622_v15 = vld [vmem:[#allocation16 + $0x228] sm:$0xf0]  ;;  %v2986_v60 = vor.u32 %v3559_v46, %v2985_v13  ;;  %v3209_v17 = vld [vmem:[#allocation16 + $0x1d8] sm:$0xf] }
 0x2ce   :  { %2248 = vmatpush.bf16.msrb.mxu2 %v3370_v33  ;;  %2274 = vmatpush.bf16.msrb.mxu3 %v3374_v35  ;;  %v3601_v33 = vld [vmem:[#allocation16 + $0x180] sm:$0xf0]  ;;  %v3201_v35 = vld [vmem:[#allocation16 + $0x1d0] sm:$0xf] }
 0x2cf   :  { %v3202_v43 = vor.u32 %v3614_v36, %v3201_v35 }
 0x2d0   :  { %2237 = vmatpush.bf16.msrb.mxu0 %v3090_v40  ;;  %2263 = vmatpush.bf16.msrb.mxu1 %v3094_v42  ;;  %v3664_v40 = vld [vmem:[#allocation16 + $0x378] sm:$0xf0]  ;;  %v3154_v42 = vor.u32 %v3601_v33, %v3153_v32 }
 0x2d2   :  { %2249 = vmatpush.bf16.msrb.mxu2 %v3342_v48  ;;  %2275 = vmatpush.bf16.msrb.mxu3 %v3346_v49  ;;  %v3406_v48 = vor.u32 %v3664_v40, %v3405_v39  ;;  %v3377_v49 = vld [vmem:[#allocation16 + $0x328] sm:$0xf]  ;;  %v1542_v40 = vperm.slane %v4142_v22, 2 }
 0x2d3   :  { %2190 = vmatmul.bf16.vlgmr.msra.gmra.mxu0 %v4121_v55  ;;  %2216 = vmatmul.bf16.vlgmr.msra.gmra.mxu1 %v4121_v55 }
 0x2d4   :  { %2238 = vmatpush.bf16.msrb.mxu0 %v3062_v54  ;;  %2264 = vmatpush.bf16.msrb.mxu1 %v3066_v56  ;;  %v3378_v54 = vor.u32 %v3657_v50, %v3377_v49  ;;  %v3349_v56 = vld [vmem:[#allocation16 + $0x2f0] sm:$0xf] }
 0x2d6   :  { %2250 = vmatpush.bf16.msrb.mxu2 %v3314_v62  ;;  %2276 = vmatpush.bf16.msrb.mxu3 %v3318_v63  ;;  %v3350_v62 = vor.u32 %v3650_v57, %v3349_v56  ;;  %v3321_v63 = vld [vmem:[#allocation16 + $0x2b8] sm:$0xf] }
 0x2d8   :  { %2239 = vmatpush.bf16.msrb.mxu0 %v3034_v4  ;;  %2265 = vmatpush.bf16.msrb.mxu1 %v3038_v7  ;;  %v3322_v4 = vor.u32 %v3643_v0, %v3321_v63  ;;  %v3293_v7 = vld [vmem:[#allocation16 + $0x280] sm:$0xf] }
 0x2d9   :  { %2203 = vmatmul.bf16.vlgmr.msra.gmra.mxu2 %v4125_v23  ;;  %2229 = vmatmul.bf16.vlgmr.msra.gmra.mxu3 %v4125_v23 }
 0x2da   :  { %2251 = vmatpush.bf16.msrb.mxu2 %v3286_v11  ;;  %2277 = vmatpush.bf16.msrb.mxu3 %v3290_v5  ;;  %v3294_v11 = vor.u32 %v3636_v8, %v3293_v7  ;;  %v3265_v5 = vld [vmem:[#allocation16 + $0x248] sm:$0xf]  ;;  %v1545_v8 = vperm.slane %v4142_v22, 5 }
 0x2dc   :  { %2240 = vmatpush.bf16.msrb.mxu0 %v3006_v14  ;;  %2266 = vmatpush.bf16.msrb.mxu1 %v3010_v6  ;;  %v3266_v14 = vor.u32 %v3629_v12, %v3265_v5  ;;  %v3237_v6 = vld [vmem:[#allocation16 + $0x210] sm:$0xf] }
 0x2dd   :  { %v3238_v16 = vor.u32 %v3622_v15, %v3237_v6 }
 0x2de   :  { %2252 = vmatpush.bf16.msrb.mxu2 %v3258_v18  ;;  %2278 = vmatpush.bf16.msrb.mxu3 %v3262_v19  ;;  %v3615_v18 = vld [vmem:[#allocation16 + $0x1f0] sm:$0xf0] }
 0x2df   :  { %v3210_v19 = vor.u32 %v3615_v18, %v3209_v17 }
 0x2e0   :  { %2241 = vmatpush.bf16.msrb.mxu0 %v2978_v27  ;;  %2267 = vmatpush.bf16.msrb.mxu1 %v2982_v28 }
 0x2e2   :  { %2253 = vmatpush.bf16.msrb.mxu2 %v3230_v30  ;;  %2279 = vmatpush.bf16.msrb.mxu3 %v3234_v31 }
 0x2e3   :  { %2242 = vmatmul.bf16.vlgmr.msrb.gmra.mxu0 %v4121_v55  ;;  %2268 = vmatmul.bf16.vlgmr.msrb.gmra.mxu1 %v4121_v55 }
 0x2e4   :  { %2286 = vmatpush.bf16.msra.mxu0 %v3182_v29 }
 0x2e6   :  { %2254 = vmatpush.bf16.msrb.mxu2 %v3202_v43  ;;  %2280 = vmatpush.bf16.msrb.mxu3 %v3206_v44 }
 0x2e8   :  { %2287 = vmatpush.bf16.msra.mxu0 %v3154_v42  ;;  %v1543_v42 = vperm.slane %v4142_v22, 3 }
 0x2e9   :  { %2255 = vmatmul.bf16.vlgmr.msrb.gmra.mxu2 %v4125_v23  ;;  %2281 = vmatmul.bf16.vlgmr.msrb.gmra.mxu3 %v4125_v23 }
 0x2ea   :  { %2299 = vmatpush.bf16.msra.mxu2 %v3406_v48 }
 0x2ec   :  { %2288 = vmatpush.bf16.msra.mxu0 %v3126_v51 }
 0x2ee   :  { %2300 = vmatpush.bf16.msra.mxu2 %v3378_v54 }
 0x2f0   :  { %2289 = vmatpush.bf16.msra.mxu0 %v3098_v58 }
 0x2f2   :  { %2301 = vmatpush.bf16.msra.mxu2 %v3350_v62 }
 0x2f4   :  { %2290 = vmatpush.bf16.msra.mxu0 %v3070_v1 }
 0x2f6   :  { %2302 = vmatpush.bf16.msra.mxu2 %v3322_v4 }
 0x2f8   :  { %2291 = vmatpush.bf16.msra.mxu0 %v3042_v9 }
 0x2fa   :  { %2303 = vmatpush.bf16.msra.mxu2 %v3294_v11 }
 0x2fc   :  { %2292 = vmatpush.bf16.msra.mxu0 %v3014_v41 }
 0x2fe   :  { %2304 = vmatpush.bf16.msra.mxu2 %v3266_v14 }
 0x300   :  { %2293 = vmatpush.bf16.msra.mxu0 %v2986_v60 }
 0x302   :  { %2305 = vmatpush.bf16.msra.mxu2 %v3238_v16 }
 0x303   :  { %2294 = vmatmul.bf16.vlgmr.msra.gmra.mxu0 %v4121_v55 }
 0x306   :  { %2306 = vmatpush.bf16.msra.mxu2 %v3210_v19 }
 0x309   :  { %2307 = vmatmul.bf16.vlgmr.msra.gmra.mxu2 %v4125_v23 }
 0x340   :  { %v2139_v20 = vpop.f32.mrf.mxu0  ;;  %v2165_v21 = vpop.f32.mrf.mxu1 }
 0x341   :  { %v2140_v28 = vadd.f32 %v2139_v20, %v1540_v24  ;;  %v2166_v29 = vadd.f32 %v2165_v21, %v1541_v25 }
 0x348   :  { %v2141_v26 = vpop.f32.mrf.mxu0  ;;  %v2167_v27 = vpop.f32.mrf.mxu1 }
 0x34c   :  { %v2152_v30 = vpop.f32.mrf.mxu2  ;;  %v2178_v55 = vpop.f32.mrf.mxu3 }
 0x34d   :  { %v2153_v31 = vadd.f32 %v2152_v30, %v2140_v28  ;;  %v2179_v32 = vadd.f32 %v2178_v55, %v2166_v29  ;;  %v1546_v29 = vperm.slane %v4142_v22, 6 }
 0x34f   :  { %v2312_v23 = vmul.f32 0.5, %v2153_v31  ;;  %v2313_v33 = vmul.f32 0.5, %v2179_v32 }
 0x350   :  { %v2191_v35 = vpop.f32.mrf.mxu0  ;;  %v2217_v36 = vpop.f32.mrf.mxu1 }
 0x351   :  { %3694 = vtanh.f32 %v2312_v23  ;;  %v2192_v51 = vadd.f32 %v2191_v35, %v1542_v40  ;;  %v2218_v52 = vadd.f32 %v2217_v36, %v1543_v42 }
 0x352   :  { %3696 = vtanh.f32 %v2313_v33 }
 0x354   :  { %v2154_v37 = vpop.f32.mrf.mxu2  ;;  %v2180_v38 = vpop.f32.mrf.mxu3 }
 0x357   :  { %v3695_v39 = vpop.eup %3694 }
 0x358   :  { %v3697_v43 = vpop.eup %3696  ;;  %v2326_v44 = vmul.f32 0.5, %v3695_v39  ;;  %v2193_v45 = vpop.f32.mrf.mxu0 }
 0x359   :  { %v2219_v47 = vpop.f32.mrf.mxu1  ;;  %v2327_v48 = vmul.f32 0.5, %v3697_v43 }
 0x35a   :  { %v2333_v49 = vadd.f32 0.5, %v2326_v44 }
 0x35b   :  { %v2334_v50 = vadd.f32 0.5, %v2327_v48 }
 0x35c   :  { %v2204_v53 = vpop.f32.mrf.mxu2  ;;  %v2230_v54 = vpop.f32.mrf.mxu3 }
 0x35d   :  { %v2340_v56 = vpack.c.bf16 %v2334_v50, %v2333_v49  ;;  %v2205_v57 = vadd.f32 %v2204_v53, %v2192_v51  ;;  %v2231_v58 = vadd.f32 %v2230_v54, %v2218_v52 }
 0x35f   :  { %2344 = vst [vmem:[#allocation17] sm:$0xff] %v2340_v56  ;;  %v2314_v59 = vmul.f32 0.5, %v2205_v57  ;;  %v2315_v61 = vmul.f32 0.5, %v2231_v58 }
 0x360   :  { %v2243_v62 = vpop.f32.mrf.mxu0 }
 0x361   :  { %v2269_v63 = vpop.f32.mrf.mxu1  ;;  %3698 = vtanh.f32 %v2314_v59  ;;  %v2244_v12 = vadd.f32 %v2243_v62, %v1544_v3 }
 0x362   :  { %3700 = vtanh.f32 %v2315_v61  ;;  %v2270_v41 = vadd.f32 %v2269_v63, %v1545_v8 }
 0x364   :  { %v2206_v0 = vpop.f32.mrf.mxu2  ;;  %v2232_v1 = vpop.f32.mrf.mxu3 }
 0x367   :  { %v3699_v2 = vpop.eup %3698 }
 0x368   :  { %v3701_v4 = vpop.eup %3700  ;;  %v2328_v7 = vmul.f32 0.5, %v3699_v2  ;;  %v2245_v9 = vpop.f32.mrf.mxu0 }
 0x369   :  { %v2271_v10 = vpop.f32.mrf.mxu1  ;;  %v2329_v34 = vmul.f32 0.5, %v3701_v4 }
 0x36a   :  { %v2335_v11 = vadd.f32 0.5, %v2328_v7 }
 0x36b   :  { %v2336_v5 = vadd.f32 0.5, %v2329_v34 }
 0x36c   :  { %v2256_v13 = vpop.f32.mrf.mxu2  ;;  %v2282_v6 = vpop.f32.mrf.mxu3 }
 0x36d   :  { %v2341_v46 = vpack.c.bf16 %v2336_v5, %v2335_v11  ;;  %v2257_v14 = vadd.f32 %v2256_v13, %v2244_v12  ;;  %v2283_v15 = vadd.f32 %v2282_v6, %v2270_v41 }
 0x36f   :  { %2345 = vst [vmem:[#allocation17 + $0x8] sm:$0xff] %v2341_v46  ;;  %v2316_v60 = vmul.f32 0.5, %v2257_v14  ;;  %v2317_v16 = vmul.f32 0.5, %v2283_v15 }
 0x371   :  { %3702 = vtanh.f32 %v2316_v60 }
 0x372   :  { %3704 = vtanh.f32 %v2317_v16 }
 0x374   :  { %v2258_v17 = vpop.f32.mrf.mxu2  ;;  %v2284_v18 = vpop.f32.mrf.mxu3 }
 0x377   :  { %v3703_v19 = vpop.eup %3702 }
 0x378   :  { %v3705_v20 = vpop.eup %3704  ;;  %v2330_v21 = vmul.f32 0.5, %v3703_v19 }
 0x379   :  { %v2331_v24 = vmul.f32 0.5, %v3705_v20 }
 0x37a   :  { %v2337_v25 = vadd.f32 0.5, %v2330_v21 }
 0x37b   :  { %v2338_v26 = vadd.f32 0.5, %v2331_v24 }
 0x37d   :  { %v2342_v27 = vpack.c.bf16 %v2338_v26, %v2337_v25 }
 0x37f   :  { %2346 = vst [vmem:[#allocation17 + $0x10] sm:$0xff] %v2342_v27 }
 0x380   :  { %v2295_v28 = vpop.f32.mrf.mxu0 }
 0x381   :  { %v2296_v55 = vadd.f32 %v2295_v28, %v1546_v29 }
 0x388   :  { %v2297_v30 = vpop.f32.mrf.mxu0 }
 0x38c   :  { %v2308_v31 = vpop.f32.mrf.mxu2 }
 0x38d   :  { %v2309_v32 = vadd.f32 %v2308_v31, %v2296_v55 }
 0x38f   :  { %v2318_v23 = vmul.f32 0.5, %v2309_v32 }
 0x391   :  { %3706 = vtanh.f32 %v2318_v23 }
 0x394   :  { %v2310_v33 = vpop.f32.mrf.mxu2 }
 0x397   :  { %v3707_v35 = vpop.eup %3706 }
 0x398   :  { %v2332_v36 = vmul.f32 0.5, %v3707_v35 }
 0x39a   :  { %v2339_v37 = vadd.f32 0.5, %v2332_v36 }
 0x39c   :  { %v2343_v38 = vpack.c.bf16 %v2339_v37, %v2339_v37 }
 0x39e   :  { %2347 = vst [vmem:[#allocation17 + $0x18] sm:$0xf] %v2343_v38 }
 0x39f   :  { %2360 = dma.vmem_to_hbm [thread:$0]  %s2356_s28, 448, %s2358_s8, [#allocation4]  }
 0x3a0   :  { %3958 = dma.done.wait [#allocation4], 448  }
 0x3a1   :  { %3959 = vsyncadd [#allocation4], 4294966848 }
 0x3a2   :  { %2367 = vsyncpa [#allocation3], 1 }
 0x3a3   :  { %2368 = vsyncpa [#allocation6], 1 }
 0x3a4   :  { %2369 = vsyncpa [#allocation9], 1 }
 0x3a5   :  { %2370 = vsyncpa [#allocation12], 1 }
 0x3a6   :  { %2371 = vsyncpa [#allocation15], 1 }
 0x3a7   :  { %2372 = vsyncpa [#allocation4], 1 }

</bundles_post_ra>
